<compile_context>
chip_gen: v6e
topology: v6e:2x2x1
jax: 0.10.0
libtpu: 0.0.40
codegen_flags: <defaults>
</compile_context>

<pallas_src>
import jax
import jax.numpy as jnp
from jax.experimental import pallas as pl
from jax.experimental.pallas import tpu as pltpu

D_IN = 256
D_HID = 512

_PARAM_ORDER = ("w1", "b1", "w2", "b2", "w3", "b3", "w4", "b4", "wp", "bp")

# bf16 activations pack 16 rows per sublane pair -> keep batch tiles a
# multiple of 16 to avoid layout padding / masked stores (esp. on v5e).
_SUBLANE = 16

# Keep the whole kernel footprint (with headroom) <= ~48 MiB so it fits
# comfortably inside v7x's 64 MiB VMEM (v5e/v6e have 128 MiB).
_VMEM_BUDGET = 48 * 1024 * 1024
_VMEM_HEADROOM = 1.25


def _round_up(n, m):
    return ((n + m - 1) // m) * m


def _param_bytes():
    # bf16 weights + f32 biases for the five layers.
    w = 2 * (4 * D_IN * D_HID + D_IN * D_IN)
    b = 4 * (2 * D_HID + 3 * D_IN)
    return w + b


def _per_row_bytes():
    # x block (bf16, double-buffered) + out block (f32, double-buffered)
    # + live f32 activation temps (~6 x (tile, 512) worst case).
    return 2 * D_IN * 2 + 2 * D_IN * 4 + 6 * D_HID * 4


def _vmem_needed(tile):
    return _param_bytes() + tile * _per_row_bytes()


def _choose_tile(B, tile_b):
    tile_b = max(_SUBLANE, _round_up(tile_b, _SUBLANE))
    # Largest tile that keeps the VMEM footprint (with headroom) in budget.
    max_tile = int((_VMEM_BUDGET / _VMEM_HEADROOM - _param_bytes())
                   // _per_row_bytes())
    max_tile = max(_SUBLANE, (max_tile // _SUBLANE) * _SUBLANE)
    if B <= _SUBLANE:
        return _SUBLANE
    # >= 2 blocks so a 2-TensorCore chip (v7x) can split the "parallel" grid,
    # and size the tile so the last block is (nearly) full instead of mostly
    # out-of-range rows.
    n_blocks = max(2, pl.cdiv(B, tile_b))
    tile = _round_up(pl.cdiv(B, n_blocks), _SUBLANE)
    return min(tile, max_tile)


def nav_branch_kernel(x_ref,
                      w1_ref, b1_ref,
                      w2_ref, b2_ref,
                      w3_ref, b3_ref,
                      w4_ref, b4_ref,
                      wp_ref, bp_ref,
                      o_ref):
    # NOTE: the last grid block may contain out-of-range (undefined) rows.
    # This is safe only because every op below is row-independent (matmuls
    # contract over the feature axis; bias/ReLU/residual are elementwise).
    # Do not add batch-axis reductions/norms here without restoring explicit
    # host-side padding.
    bf16 = jnp.bfloat16
    x16 = x_ref[...]                            # (TB, 256) bf16
    x32 = x16.astype(jnp.float32)               # f32 copy for the residual add

    # h = relu(fc1(x))
    h = jnp.dot(x16, w1_ref[...], preferred_element_type=jnp.float32)
    h = jnp.maximum(h + b1_ref[...], 0.0)                         # (TB, 512)

    # h = relu(fc2(h) + x)
    h = jnp.dot(h.astype(bf16), w2_ref[...], preferred_element_type=jnp.float32)
    h = jnp.maximum(h + b2_ref[...] + x32, 0.0)                   # (TB, 256)

    # h2 = relu(fc3(h))
    h2 = jnp.dot(h.astype(bf16), w3_ref[...], preferred_element_type=jnp.float32)
    h2 = jnp.maximum(h2 + b3_ref[...], 0.0)                       # (TB, 512)

    # h = relu(fc4(h2) + h)
    h4 = jnp.dot(h2.astype(bf16), w4_ref[...], preferred_element_type=jnp.float32)
    h = jnp.maximum(h4 + b4_ref[...] + h, 0.0)                    # (TB, 256)

    # out = relu(project(h))
    out = jnp.dot(h.astype(bf16), wp_ref[...], preferred_element_type=jnp.float32)
    o_ref[...] = jnp.maximum(out + bp_ref[...], 0.0)              # (TB, 256)


def nav_branch(x, params, *, tile_b=1024):
    """x: (B, 256). params: dict of pre-transposed (in, out) weights and
    (1, out) biases. tile_b is the target batch tile (primary tuning knob)."""
    B, D = x.shape
    assert D == D_IN

    tile = _choose_tile(B, tile_b)
    grid = pl.cdiv(B, tile)

    # x hits the MXU in bf16 anyway; feeding it as bf16 halves input HBM
    # traffic and the x VMEM block. No host-side padding (see kernel NOTE).
    x16 = x.astype(jnp.bfloat16)

    args = []
    for name in _PARAM_ORDER:
        p = params[name]
        args.append(p.astype(jnp.bfloat16) if name.startswith("w")
                    else p.astype(jnp.float32))

    vmem_limit = int(max(_vmem_needed(tile) * _VMEM_HEADROOM,
                         32 * 1024 * 1024))

    flops = 2 * B * (4 * D_IN * D_HID + D_IN * D_IN)
    bytes_accessed = B * D_IN * (2 + 4) + _param_bytes()
    cost = pl.CostEstimate(flops=flops, transcendentals=0,
                           bytes_accessed=bytes_accessed)

    x_spec = pl.BlockSpec((tile, D_IN), lambda i: (i, 0))
    out_spec = pl.BlockSpec((tile, D_IN), lambda i: (i, 0))

    def build(weight_buffers):
        def w_spec(shape):
            if weight_buffers == 1:
                # Same block every grid step -> never re-DMA'd; single-buffer
                # it to halve the (small, ~1.2 MiB) weight VMEM footprint.
                return pl.BlockSpec(shape, lambda i: (0,) * len(shape),
                                    pipeline_mode=pl.Buffered(1))
            return pl.BlockSpec(shape, lambda i: (0,) * len(shape))

        in_specs = [x_spec] + [w_spec(a.shape) for a in args]
        return pl.pallas_call(
            nav_branch_kernel,
            out_shape=jax.ShapeDtypeStruct((B, D_IN), jnp.float32),
            grid_spec=pl.GridSpec(grid=(grid,), in_specs=in_specs,
                                  out_specs=out_spec),
            compiler_params=pltpu.CompilerParams(
                dimension_semantics=("parallel",),
                vmem_limit_bytes=vmem_limit),
            cost_estimate=cost,
        )

    if hasattr(pl, "Buffered"):
        try:
            return build(1)(x16, *args)
        except (TypeError, NotImplementedError, pltpu.LoweringException):
            # Narrow fallback: only for jax versions that reject
            # pipeline_mode=pl.Buffered(1) on the weight specs. Genuine runtime
            # failures (e.g. VMEM exhaustion -> XlaRuntimeError) propagate.
            pass
    return build(2)(x16, *args)


def init_params(key):
    """Deterministic init mimicking nn.Linear (uniform +-1/sqrt(fan_in)).
    PyTorch stores weights as (out, in); we store the transpose (in, out)."""
    params = {}
    layer_dims = {"1": (D_IN, D_HID), "2": (D_HID, D_IN),
                  "3": (D_IN, D_HID), "4": (D_HID, D_IN), "p": (D_IN, D_IN)}
    for suffix, (fan_in, fan_out) in layer_dims.items():
        key, kw, kb = jax.random.split(key, 3)
        bound = 1.0 / jnp.sqrt(jnp.float32(fan_in))
        params[f"w{suffix}"] = jax.random.uniform(
            kw, (fan_in, fan_out), jnp.float32, -bound, bound)
        params[f"b{suffix}"] = jax.random.uniform(
            kb, (1, fan_out), jnp.float32, -bound, bound)
    return params


def nav_branch_ref(x, p):
    """Pure-JAX f32 reference of the PyTorch forward."""
    h = jax.nn.relu(x @ p["w1"] + p["b1"])
    h = jax.nn.relu(h @ p["w2"] + p["b2"] + x)
    h2 = jax.nn.relu(h @ p["w3"] + p["b3"])
    h = jax.nn.relu(h2 @ p["w4"] + p["b4"] + h)
    return jax.nn.relu(h @ p["wp"] + p["bp"])


def nav_branch_ref_bf16(x, p):
    """Reference with the kernel's exact numerics: bf16 x (also used, upcast
    to f32, for the residual), bf16 MXU inputs, f32 accumulation."""
    bf = jnp.bfloat16
    x16 = x.astype(bf)
    x32 = x16.astype(jnp.float32)

    def lin(a, w, b):
        return jnp.dot(a.astype(bf), w.astype(bf),
                       preferred_element_type=jnp.float32) + b

    h = jax.nn.relu(lin(x16, p["w1"], p["b1"]))
    h = jax.nn.relu(lin(h, p["w2"], p["b2"]) + x32)
    h2 = jax.nn.relu(lin(h, p["w3"], p["b3"]))
    h = jax.nn.relu(lin(h2, p["w4"], p["b4"]) + h)
    return jax.nn.relu(lin(h, p["wp"], p["bp"]))


if __name__ == "__main__":
    key = jax.random.PRNGKey(0)
    key, kx1, kx2, kx3 = jax.random.split(key, 4)
    params = init_params(key)

    # Small demo shapes (the module's feature width is fixed at 256).
    B = 16
    x = jax.random.normal(kx1, (B, D_IN), jnp.float32)
    out = jax.block_until_ready(nav_branch(x, params))
    assert out.shape == (B, D_IN)
    assert jnp.allclose(out, nav_branch_ref_bf16(x, params), atol=1e-3, rtol=1e-3)
    assert jnp.allclose(out, nav_branch_ref(x, params), atol=1e-1, rtol=1e-1)

    # Multi-step grid with a partial final block (B=40, tile 16 -> grid=3).
    B2 = 40
    x2 = jax.random.normal(kx2, (B2, D_IN), jnp.float32)
    out2 = jax.block_until_ready(nav_branch(x2, params, tile_b=16))
    assert out2.shape == (B2, D_IN)
    assert jnp.allclose(out2, nav_branch_ref_bf16(x2, params), atol=1e-3, rtol=1e-3)

    # Single partial block smaller than the tile (B=13 < tile=16).
    B3 = 13
    x3 = jax.random.normal(kx3, (B3, D_IN), jnp.float32)
    out3 = jax.block_until_ready(nav_branch(x3, params, tile_b=8))
    assert out3.shape == (B3, D_IN)
    assert jnp.allclose(out3, nav_branch_ref_bf16(x3, params), atol=1e-3, rtol=1e-3)

    print("KERNEL_OK")
</pallas_src>

<mosaic_0001>
module attributes {stable_mosaic.version = 11 : i64} {
  func.func @nav_branch_kernel(%arg0: i32, %arg1: memref<16x256xbf16, #tpu.memory_space<vmem>>, %arg2: memref<256x512xbf16, #tpu.memory_space<vmem>>, %arg3: memref<1x512xf32, #tpu.memory_space<vmem>>, %arg4: memref<512x256xbf16, #tpu.memory_space<vmem>>, %arg5: memref<1x256xf32, #tpu.memory_space<vmem>>, %arg6: memref<256x512xbf16, #tpu.memory_space<vmem>>, %arg7: memref<1x512xf32, #tpu.memory_space<vmem>>, %arg8: memref<512x256xbf16, #tpu.memory_space<vmem>>, %arg9: memref<1x256xf32, #tpu.memory_space<vmem>>, %arg10: memref<256x256xbf16, #tpu.memory_space<vmem>>, %arg11: memref<1x256xf32, #tpu.memory_space<vmem>>, %arg12: memref<16x256xf32, #tpu.memory_space<vmem>>) attributes {dimension_semantics = [#tpu.dimension_semantics<parallel>], iteration_bounds = array<i64: 1>, scalar_prefetch = 0 : i64, scratch_operands = 0 : i64, tpu.core_type = #tpu.core_type<tc>, window_params = [{transform_indices = @transform_0, window_bounds = array<i64: 16, 256>}, {pipeline_mode = #tpu.pipeline_mode<synchronous>, transform_indices = @transform_1, window_bounds = array<i64: 256, 512>}, {pipeline_mode = #tpu.pipeline_mode<synchronous>, transform_indices = @transform_2, window_bounds = array<i64: 1, 512>}, {pipeline_mode = #tpu.pipeline_mode<synchronous>, transform_indices = @transform_3, window_bounds = array<i64: 512, 256>}, {pipeline_mode = #tpu.pipeline_mode<synchronous>, transform_indices = @transform_4, window_bounds = array<i64: 1, 256>}, {pipeline_mode = #tpu.pipeline_mode<synchronous>, transform_indices = @transform_5, window_bounds = array<i64: 256, 512>}, {pipeline_mode = #tpu.pipeline_mode<synchronous>, transform_indices = @transform_6, window_bounds = array<i64: 1, 512>}, {pipeline_mode = #tpu.pipeline_mode<synchronous>, transform_indices = @transform_7, window_bounds = array<i64: 512, 256>}, {pipeline_mode = #tpu.pipeline_mode<synchronous>, transform_indices = @transform_8, window_bounds = array<i64: 1, 256>}, {pipeline_mode = #tpu.pipeline_mode<synchronous>, transform_indices = @transform_9, window_bounds = array<i64: 256, 256>}, {pipeline_mode = #tpu.pipeline_mode<synchronous>, transform_indices = @transform_10, window_bounds = array<i64: 1, 256>}, {transform_indices = @transform_11, window_bounds = array<i64: 16, 256>}]} {
    %c0 = arith.constant 0 : index
    %c0_0 = arith.constant 0 : index
    %0 = vector.load %arg1[%c0, %c0_0] : memref<16x256xbf16, #tpu.memory_space<vmem>>, vector<16x256xbf16>
    %1 = arith.extf %0 : vector<16x256xbf16> to vector<16x256xf32>
    %c0_1 = arith.constant 0 : index
    %c0_2 = arith.constant 0 : index
    %2 = vector.load %arg2[%c0_1, %c0_2] : memref<256x512xbf16, #tpu.memory_space<vmem>>, vector<256x512xbf16>
    %cst = arith.constant dense<0.000000e+00> : vector<16x512xf32>
    %3 = tpu.matmul %0, %2, %cst {dimension_numbers = #tpu.dot_dimension_numbers<[1], [0], [0], [1], [0, 0, 1, 1], [], []>} : vector<16x256xbf16>, vector<256x512xbf16>, vector<16x512xf32> -> vector<16x512xf32>
    %c0_3 = arith.constant 0 : index
    %c0_4 = arith.constant 0 : index
    %4 = vector.load %arg3[%c0_3, %c0_4] : memref<1x512xf32, #tpu.memory_space<vmem>>, vector<1x512xf32>
    %5 = vector.broadcast %4 : vector<1x512xf32> to vector<16x512xf32>
    %6 = arith.addf %3, %5 : vector<16x512xf32>
    %cst_5 = arith.constant 0.000000e+00 : f32
    %7 = vector.broadcast %cst_5 : f32 to vector<16x512xf32>
    %8 = arith.maximumf %6, %7 : vector<16x512xf32>
    %9 = arith.truncf %8 : vector<16x512xf32> to vector<16x512xbf16>
    %c0_6 = arith.constant 0 : index
    %c0_7 = arith.constant 0 : index
    %10 = vector.load %arg4[%c0_6, %c0_7] : memref<512x256xbf16, #tpu.memory_space<vmem>>, vector<512x256xbf16>
    %cst_8 = arith.constant dense<0.000000e+00> : vector<16x256xf32>
    %11 = tpu.matmul %9, %10, %cst_8 {dimension_numbers = #tpu.dot_dimension_numbers<[1], [0], [0], [1], [0, 0, 1, 1], [], []>} : vector<16x512xbf16>, vector<512x256xbf16>, vector<16x256xf32> -> vector<16x256xf32>
    %c0_9 = arith.constant 0 : index
    %c0_10 = arith.constant 0 : index
    %12 = vector.load %arg5[%c0_9, %c0_10] : memref<1x256xf32, #tpu.memory_space<vmem>>, vector<1x256xf32>
    %13 = vector.broadcast %12 : vector<1x256xf32> to vector<16x256xf32>
    %14 = arith.addf %11, %13 : vector<16x256xf32>
    %15 = arith.addf %14, %1 : vector<16x256xf32>
    %cst_11 = arith.constant 0.000000e+00 : f32
    %16 = vector.broadcast %cst_11 : f32 to vector<16x256xf32>
    %17 = arith.maximumf %15, %16 : vector<16x256xf32>
    %18 = arith.truncf %17 : vector<16x256xf32> to vector<16x256xbf16>
    %c0_12 = arith.constant 0 : index
    %c0_13 = arith.constant 0 : index
    %19 = vector.load %arg6[%c0_12, %c0_13] : memref<256x512xbf16, #tpu.memory_space<vmem>>, vector<256x512xbf16>
    %cst_14 = arith.constant dense<0.000000e+00> : vector<16x512xf32>
    %20 = tpu.matmul %18, %19, %cst_14 {dimension_numbers = #tpu.dot_dimension_numbers<[1], [0], [0], [1], [0, 0, 1, 1], [], []>} : vector<16x256xbf16>, vector<256x512xbf16>, vector<16x512xf32> -> vector<16x512xf32>
    %c0_15 = arith.constant 0 : index
    %c0_16 = arith.constant 0 : index
    %21 = vector.load %arg7[%c0_15, %c0_16] : memref<1x512xf32, #tpu.memory_space<vmem>>, vector<1x512xf32>
    %22 = vector.broadcast %21 : vector<1x512xf32> to vector<16x512xf32>
    %23 = arith.addf %20, %22 : vector<16x512xf32>
    %cst_17 = arith.constant 0.000000e+00 : f32
    %24 = vector.broadcast %cst_17 : f32 to vector<16x512xf32>
    %25 = arith.maximumf %23, %24 : vector<16x512xf32>
    %26 = arith.truncf %25 : vector<16x512xf32> to vector<16x512xbf16>
    %c0_18 = arith.constant 0 : index
    %c0_19 = arith.constant 0 : index
    %27 = vector.load %arg8[%c0_18, %c0_19] : memref<512x256xbf16, #tpu.memory_space<vmem>>, vector<512x256xbf16>
    %cst_20 = arith.constant dense<0.000000e+00> : vector<16x256xf32>
    %28 = tpu.matmul %26, %27, %cst_20 {dimension_numbers = #tpu.dot_dimension_numbers<[1], [0], [0], [1], [0, 0, 1, 1], [], []>} : vector<16x512xbf16>, vector<512x256xbf16>, vector<16x256xf32> -> vector<16x256xf32>
    %c0_21 = arith.constant 0 : index
    %c0_22 = arith.constant 0 : index
    %29 = vector.load %arg9[%c0_21, %c0_22] : memref<1x256xf32, #tpu.memory_space<vmem>>, vector<1x256xf32>
    %30 = vector.broadcast %29 : vector<1x256xf32> to vector<16x256xf32>
    %31 = arith.addf %28, %30 : vector<16x256xf32>
    %32 = arith.addf %31, %17 : vector<16x256xf32>
    %cst_23 = arith.constant 0.000000e+00 : f32
    %33 = vector.broadcast %cst_23 : f32 to vector<16x256xf32>
    %34 = arith.maximumf %32, %33 : vector<16x256xf32>
    %35 = arith.truncf %34 : vector<16x256xf32> to vector<16x256xbf16>
    %c0_24 = arith.constant 0 : index
    %c0_25 = arith.constant 0 : index
    %36 = vector.load %arg10[%c0_24, %c0_25] : memref<256x256xbf16, #tpu.memory_space<vmem>>, vector<256x256xbf16>
    %cst_26 = arith.constant dense<0.000000e+00> : vector<16x256xf32>
    %37 = tpu.matmul %35, %36, %cst_26 {dimension_numbers = #tpu.dot_dimension_numbers<[1], [0], [0], [1], [0, 0, 1, 1], [], []>} : vector<16x256xbf16>, vector<256x256xbf16>, vector<16x256xf32> -> vector<16x256xf32>
    %c0_27 = arith.constant 0 : index
    %c0_28 = arith.constant 0 : index
    %38 = vector.load %arg11[%c0_27, %c0_28] : memref<1x256xf32, #tpu.memory_space<vmem>>, vector<1x256xf32>
    %39 = vector.broadcast %38 : vector<1x256xf32> to vector<16x256xf32>
    %40 = arith.addf %37, %39 : vector<16x256xf32>
    %cst_29 = arith.constant 0.000000e+00 : f32
    %41 = vector.broadcast %cst_29 : f32 to vector<16x256xf32>
    %42 = arith.maximumf %40, %41 : vector<16x256xf32>
    %c0_30 = arith.constant 0 : index
    %c0_31 = arith.constant 0 : index
    %43 = vector.load %arg12[%c0_30, %c0_31] : memref<16x256xf32, #tpu.memory_space<vmem>>, vector<16x256xf32>
    tpu.vector_store %arg12[%c0_30, %c0_31], %42 {strides = array<i32>} : memref<16x256xf32, #tpu.memory_space<vmem>>, vector<16x256xf32>,
    return
  }
  func.func @transform_0(%arg0: i32) -> (i32, i32) {
    %c0_i32 = arith.constant 0 : i32
    %c0_i32_0 = arith.constant 0 : i32
    return %arg0, %c0_i32 : i32, i32
  }
  func.func @transform_1(%arg0: i32) -> (i32, i32) {
    %c0_i32 = arith.constant 0 : i32
    %c0_i32_0 = arith.constant 0 : i32
    %c0_i32_1 = arith.constant 0 : i32
    return %c0_i32, %c0_i32_0 : i32, i32
  }
  func.func @transform_2(%arg0: i32) -> (i32, i32) {
    %c0_i32 = arith.constant 0 : i32
    %c0_i32_0 = arith.constant 0 : i32
    %c0_i32_1 = arith.constant 0 : i32
    return %c0_i32, %c0_i32_0 : i32, i32
  }
  func.func @transform_3(%arg0: i32) -> (i32, i32) {
    %c0_i32 = arith.constant 0 : i32
    %c0_i32_0 = arith.constant 0 : i32
    %c0_i32_1 = arith.constant 0 : i32
    return %c0_i32, %c0_i32_0 : i32, i32
  }
  func.func @transform_4(%arg0: i32) -> (i32, i32) {
    %c0_i32 = arith.constant 0 : i32
    %c0_i32_0 = arith.constant 0 : i32
    %c0_i32_1 = arith.constant 0 : i32
    return %c0_i32, %c0_i32_0 : i32, i32
  }
  func.func @transform_5(%arg0: i32) -> (i32, i32) {
    %c0_i32 = arith.constant 0 : i32
    %c0_i32_0 = arith.constant 0 : i32
    %c0_i32_1 = arith.constant 0 : i32
    return %c0_i32, %c0_i32_0 : i32, i32
  }
  func.func @transform_6(%arg0: i32) -> (i32, i32) {
    %c0_i32 = arith.constant 0 : i32
    %c0_i32_0 = arith.constant 0 : i32
    %c0_i32_1 = arith.constant 0 : i32
    return %c0_i32, %c0_i32_0 : i32, i32
  }
  func.func @transform_7(%arg0: i32) -> (i32, i32) {
    %c0_i32 = arith.constant 0 : i32
    %c0_i32_0 = arith.constant 0 : i32
    %c0_i32_1 = arith.constant 0 : i32
    return %c0_i32, %c0_i32_0 : i32, i32
  }
  func.func @transform_8(%arg0: i32) -> (i32, i32) {
    %c0_i32 = arith.constant 0 : i32
    %c0_i32_0 = arith.constant 0 : i32
    %c0_i32_1 = arith.constant 0 : i32
    return %c0_i32, %c0_i32_0 : i32, i32
  }
  func.func @transform_9(%arg0: i32) -> (i32, i32) {
    %c0_i32 = arith.constant 0 : i32
    %c0_i32_0 = arith.constant 0 : i32
    %c0_i32_1 = arith.constant 0 : i32
    return %c0_i32, %c0_i32_0 : i32, i32
  }
  func.func @transform_10(%arg0: i32) -> (i32, i32) {
    %c0_i32 = arith.constant 0 : i32
    %c0_i32_0 = arith.constant 0 : i32
    %c0_i32_1 = arith.constant 0 : i32
    return %c0_i32, %c0_i32_0 : i32, i32
  }
  func.func @transform_11(%arg0: i32) -> (i32, i32) {
    %c0_i32 = arith.constant 0 : i32
    %c0_i32_0 = arith.constant 0 : i32
    return %arg0, %c0_i32 : i32, i32
  }
}

</mosaic_0001>

<bundles_post_ra>
// kernel: tpu_custom_call.1
= control target key start
LH: loop header
LB: loop body
LE: loop exit
PB: predicated region body
PF: predicated region fallthrough
CT: control target
= control target key end

     0   :  { %16 = vsyncpa [#allocation3], 0  ;;  %s3508_s0 = inlined_call_operand.hbm [shape: bf16[16,256], index: 0, kind: input, shape index: {}]   ;;  %s3509_s1 = inlined_call_operand.hbm [shape: bf16[256,512], index: 1, kind: input, shape index: {}]   ;;  %s3510_s2 = inlined_call_operand.hbm [shape: f32[1,512], index: 2, kind: input, shape index: {}]   ;;  %s3511_s3 = inlined_call_operand.hbm [shape: bf16[512,256], index: 3, kind: input, shape index: {}]   ;;  %s3512_s4 = inlined_call_operand.vmem [shape: f32[1,256], index: 4, kind: input, shape index: {}]   ;;  %s3513_s5 = inlined_call_operand.hbm [shape: bf16[256,512], index: 5, kind: input, shape index: {}]   ;;  %s3514_s6 = inlined_call_operand.vmem [shape: f32[1,512], index: 6, kind: input, shape index: {}]   ;;  %s3515_s7 = inlined_call_operand.hbm [shape: bf16[512,256], index: 7, kind: input, shape index: {}]   ;;  %s3516_s8 = inlined_call_operand.vmem [shape: f32[1,256], index: 8, kind: input, shape index: {}]   ;;  %s3517_s9 = inlined_call_operand.hbm [shape: bf16[256,256], index: 9, kind: input, shape index: {}]   ;;  %s3518_s10 = inlined_call_operand.vmem [shape: f32[1,256], index: 10, kind: input, shape index: {}]   ;;  %s3519_s11 = inlined_call_operand.hbm [shape: f32[16,256], index: 11, kind: output, shape index: {}]  }
   0x1   :  { %17 = vsyncpa [#allocation6], 0 }
   0x2   :  { %18 = vsyncpa [#allocation9], 0 }
   0x3   :  { %19 = vsyncpa [#allocation12], 0 }
   0x4   :  { %20 = vsyncpa [#allocation4], 0  ;;  %s3323_s17 = smov [#allocation5]  }
   0x5   :  { %s38_s18 = sshll.u32 %s3323_s17, 4  ;;  %s39_s18 = int_to_ptr.vmem [resolvable:$true] %s38_s18 }
   0x6   :  { %s3161_s19 = scalar_lea.vmem %s39_s18, 8192  ;;  %p3166_p1 = scmp.lt.s32.totalorder %s39_s18, %s39_s18 }
   0x7   :  { %p3162_p0 = scmp.ne.s32.totalorder %s39_s18, %s3161_s19  ;;  %p3167_p2 = scmp.lt.s32.totalorder %s3161_s19, %s3161_s19 }
   0x9   :  { %p3168_p3 = por %p3167_p2, %p3166_p1 }
   0xb   :  { %p3169_p4 = pnand %p3168_p3, %p3162_p0 }
   0xd   :  { %3172 = shalt.err (!%p3169_p4)
}
   0xe   :  { %s3324_s20 = smov 256   ;;  %s3325_s21 = smov 16  }
   0xf   :  { %44 = dma.hbm_to_vmem [thread:$0]  %s3509_s1, 8192, %s39_s18, [#allocation6], %s3324_s20, %s3324_s20, %s3325_s21  }
  0x10   :  { %s3326_s24 = smov [#allocation8]   ;;  %s3327_s26 = smov [#allocation11]  }
  0x11   :  { %s60_s25 = sshll.u32 %s3326_s24, 4  ;;  %s88_s27 = sshll.u32 %s3327_s26, 4  ;;  %s61_s25 = int_to_ptr.vmem [resolvable:$true] %s60_s25  ;;  %s89_s27 = int_to_ptr.vmem [resolvable:$true] %s88_s27 }
  0x12   :  { %s3181_s28 = scalar_lea.vmem %s61_s25, 8192  ;;  %p3186_p6 = scmp.lt.s32.totalorder %s61_s25, %s61_s25 }
  0x13   :  { %p3182_p5 = scmp.ne.s32.totalorder %s61_s25, %s3181_s28  ;;  %p3187_p7 = scmp.lt.s32.totalorder %s3181_s28, %s3181_s28 }
  0x15   :  { %p3188_p8 = por %p3187_p7, %p3186_p6 }
  0x17   :  { %p3189_p9 = pnand %p3188_p8, %p3182_p5 }
  0x19   :  { %3192 = shalt.err (!%p3189_p9)
}
  0x1a   :  { %s3328_s29 = smov 128   ;;  %s3329_s30 = smov 8  }
  0x1b   :  { %66 = dma.hbm_to_vmem [thread:$0]  %s3511_s3, 8192, %s61_s25, [#allocation9], %s3328_s29, %s3328_s29, %s3329_s30  }
  0x1c   :  { %s3201_s1 = scalar_lea.vmem %s89_s27, 8192  ;;  %p3206_p11 = scmp.lt.s32.totalorder %s89_s27, %s89_s27 }
  0x1d   :  { %p3202_p10 = scmp.ne.s32.totalorder %s89_s27, %s3201_s1  ;;  %p3207_p12 = scmp.lt.s32.totalorder %s3201_s1, %s3201_s1 }
  0x1f   :  { %p3208_p13 = por %p3207_p12, %p3206_p11 }
  0x21   :  { %p3209_p0 = pnand %p3208_p13, %p3202_p10 }
  0x23   :  { %3212 = shalt.err (!%p3209_p0)
}
  0x24   :  { %94 = dma.hbm_to_vmem [thread:$0]  %s3515_s7, 8192, %s89_s27, [#allocation12], %s3328_s29, %s3328_s29, %s3329_s30  }
  0x25   :  { %s3330_s16 = smov [#allocation2]   ;;  %s3331_s18 = smov [#allocation7]  }
  0x26   :  { %s26_s17 = sshll.u32 %s3330_s16, 4  ;;  %s51_s3 = sshll.u32 %s3331_s18, 4  ;;  %s27_s17 = int_to_ptr.vmem [resolvable:$true] %s26_s17  ;;  %s52_s3 = int_to_ptr.vmem [resolvable:$true] %s51_s3 }
  0x27   :  { %s3221_s19 = scalar_lea.vmem %s27_s17, 256  ;;  %p3226_p2 = scmp.lt.s32.totalorder %s27_s17, %s27_s17 }
  0x28   :  { %p3222_p1 = scmp.ne.s32.totalorder %s27_s17, %s3221_s19  ;;  %p3227_p3 = scmp.lt.s32.totalorder %s3221_s19, %s3221_s19 }
  0x2a   :  { %p3228_p4 = por %p3227_p3, %p3226_p2 }
  0x2c   :  { %p3229_p5 = pnand %p3228_p4, %p3222_p1 }
  0x2e   :  { %3232 = shalt.err (!%p3229_p5)
}
  0x2f   :  { %32 = dma.hbm_to_vmem [thread:$0]  %s3508_s0, 256, %s27_s17, [#allocation3], %s3328_s29, %s3328_s29, %s3329_s30  }
  0x30   :  { %s3241_s7 = scalar_lea.vmem %s52_s3, 64  ;;  %p3246_p7 = scmp.lt.s32.totalorder %s52_s3, %s52_s3 }
  0x31   :  { %p3242_p6 = scmp.ne.s32.totalorder %s52_s3, %s3241_s7  ;;  %p3247_p8 = scmp.lt.s32.totalorder %s3241_s7, %s3241_s7 }
  0x33   :  { %p3248_p9 = por %p3247_p8, %p3246_p7 }
  0x35   :  { %p3249_p10 = pnand %p3248_p9, %p3242_p6 }
  0x37   :  { %3252 = shalt.err (!%p3249_p10)
}
  0x38   :  { %54 = dma.hbm_to_vmem [thread:$0]  %s3510_s2, 64, %s52_s3, [#allocation6]  }
  0x39   :  { %s3332_s26 = smov [#allocation10]   ;;  %s3333_s28 = smov [#allocation13]  }
  0x3a   :  { %s74_s27 = sshll.u32 %s3332_s26, 4  ;;  %s102_s12 = sshll.u32 %s3333_s28, 4  ;;  %s75_s27 = int_to_ptr.vmem [resolvable:$true] %s74_s27  ;;  %s103_s12 = int_to_ptr.vmem [resolvable:$true] %s102_s12 }
  0x3b   :  { %s3261_s13 = scalar_lea.vmem %s75_s27, 8192  ;;  %p3266_p12 = scmp.lt.s32.totalorder %s75_s27, %s75_s27 }
  0x3c   :  { %p3262_p11 = scmp.ne.s32.totalorder %s75_s27, %s3261_s13  ;;  %p3267_p13 = scmp.lt.s32.totalorder %s3261_s13, %s3261_s13 }
  0x3e   :  { %p3268_p0 = por %p3267_p13, %p3266_p12 }
  0x40   :  { %p3269_p1 = pnand %p3268_p0, %p3262_p11 }
  0x42   :  { %3272 = shalt.err (!%p3269_p1)
}
  0x43   :  { %80 = dma.hbm_to_vmem [thread:$0]  %s3513_s5, 8192, %s75_s27, [#allocation9], %s3324_s20, %s3324_s20, %s3325_s21  }
  0x44   :  { %s3281_s2 = scalar_lea.vmem %s103_s12, 4096  ;;  %p3286_p3 = scmp.lt.s32.totalorder %s103_s12, %s103_s12 }
  0x45   :  { %p3282_p2 = scmp.ne.s32.totalorder %s103_s12, %s3281_s2  ;;  %p3287_p4 = scmp.lt.s32.totalorder %s3281_s2, %s3281_s2 }
  0x47   :  { %p3288_p5 = por %p3287_p4, %p3286_p3 }
  0x49   :  { %p3289_p6 = pnand %p3288_p5, %p3282_p2 }
  0x4b   :  { %3292 = shalt.err (!%p3289_p6)
}
  0x4c   :  { %108 = dma.hbm_to_vmem [thread:$0]  %s3517_s9, 4096, %s103_s12, [#allocation12], %s3328_s29, %s3328_s29, %s3329_s30  }
  0x4d   :  { %3313 = dma.done.wait [#allocation3], 256  }
  0x4e   :  { %3314 = vsyncadd [#allocation3], 4294967040 }
  0x4f   :  { %3315 = dma.done.wait [#allocation6], 8256  }
  0x50   :  { %3316 = vsyncadd [#allocation6], 4294959040 }
  0x51   :  { %3317 = dma.done.wait [#allocation9], 16384  }
  0x52   :  { %3318 = vsyncadd [#allocation9], 4294950912 }
  0x53   :  { %3319 = dma.done.wait [#allocation12], 12288  }
  0x54   :  { %3320 = vsyncadd [#allocation12], 4294955008  ;;  %v2717_v0 = vld [vmem:[#allocation5 + $0xe4] ss:$16 sps:$4 sm:$0xff]   ;;  %v2719_v1 = vld [vmem:[#allocation5 + $0xec] ss:$16 sps:$4 sm:$0xff]  }
  0x55   :  { %554 = vmatprep.subr.bf16.mxu0 %v2717_v0  ;;  %v2721_v2 = vld [vmem:[#allocation5 + $0xe0] ss:$16 sps:$4 sm:$0xff]   ;;  %v2722_v3 = vld [vmem:[#allocation5 + $0xe8] ss:$16 sps:$4 sm:$0xff]   ;;  %597 = vmatprep.subr.bf16.mxu1 %v2719_v1  ;;  %v2723_v4 = vld [vmem:[#allocation5 + $0xc4] ss:$16 sps:$4 sm:$0xff]  }
  0x56   :  { %555 = vmatpush1.bf16.msra.mxu0 %v2721_v2  ;;  %598 = vmatpush1.bf16.msra.mxu1 %v2722_v3  ;;  %v2725_v5 = vld [vmem:[#allocation5 + $0xcc] ss:$16 sps:$4 sm:$0xff]   ;;  %v2727_v6 = vld [vmem:[#allocation5 + $0xc0] ss:$16 sps:$4 sm:$0xff]   ;;  %v2728_v7 = vld [vmem:[#allocation5 + $0xc8] ss:$16 sps:$4 sm:$0xff]  }
  0x57   :  { %556 = vmatprep.subr.bf16.mxu0 %v2723_v4  ;;  %599 = vmatprep.subr.bf16.mxu1 %v2725_v5  ;;  %v2729_v8 = vld [vmem:[#allocation5 + $0xa4] ss:$16 sps:$4 sm:$0xff]   ;;  %v2731_v9 = vld [vmem:[#allocation5 + $0xac] ss:$16 sps:$4 sm:$0xff]   ;;  %v2733_v10 = vld [vmem:[#allocation5 + $0xa0] ss:$16 sps:$4 sm:$0xff]  }
  0x58   :  { %v2734_v11 = vld [vmem:[#allocation5 + $0xa8] ss:$16 sps:$4 sm:$0xff]   ;;  %v2735_v12 = vld [vmem:[#allocation5 + $0x84] ss:$16 sps:$4 sm:$0xff]   ;;  %v2737_v13 = vld [vmem:[#allocation5 + $0x8c] ss:$16 sps:$4 sm:$0xff]  }
  0x59   :  { %v2739_v14 = vld [vmem:[#allocation5 + $0x80] ss:$16 sps:$4 sm:$0xff]   ;;  %v2740_v15 = vld [vmem:[#allocation5 + $0x88] ss:$16 sps:$4 sm:$0xff]   ;;  %v2741_v16 = vld [vmem:[#allocation5 + $0x64] ss:$16 sps:$4 sm:$0xff]  }
  0x5a   :  { %557 = vmatpush1.bf16.msra.mxu0 %v2727_v6  ;;  %600 = vmatpush1.bf16.msra.mxu1 %v2728_v7  ;;  %v2743_v17 = vld [vmem:[#allocation5 + $0x6c] ss:$16 sps:$4 sm:$0xff]   ;;  %v2745_v18 = vld [vmem:[#allocation5 + $0x60] ss:$16 sps:$4 sm:$0xff]   ;;  %v2746_v19 = vld [vmem:[#allocation5 + $0x68] ss:$16 sps:$4 sm:$0xff]  }
  0x5b   :  { %558 = vmatprep.subr.bf16.mxu0 %v2729_v8  ;;  %601 = vmatprep.subr.bf16.mxu1 %v2731_v9  ;;  %v2747_v20 = vld [vmem:[#allocation5 + $0x44] ss:$16 sps:$4 sm:$0xff]   ;;  %v2749_v21 = vld [vmem:[#allocation5 + $0x4c] ss:$16 sps:$4 sm:$0xff]   ;;  %v2751_v22 = vld [vmem:[#allocation5 + $0x40] ss:$16 sps:$4 sm:$0xff]  }
  0x5c   :  { %v2752_v23 = vld [vmem:[#allocation5 + $0x48] ss:$16 sps:$4 sm:$0xff]   ;;  %v2753_v24 = vld [vmem:[#allocation5 + $0x24] ss:$16 sps:$4 sm:$0xff]   ;;  %v2755_v25 = vld [vmem:[#allocation5 + $0x2c] ss:$16 sps:$4 sm:$0xff]  }
  0x5d   :  { %v2757_v26 = vld [vmem:[#allocation5 + $0x20] ss:$16 sps:$4 sm:$0xff]   ;;  %v2758_v27 = vld [vmem:[#allocation5 + $0x28] ss:$16 sps:$4 sm:$0xff]   ;;  %v2759_v28 = vld [vmem:[#allocation5 + $0x4] ss:$16 sps:$4 sm:$0xff]  }
  0x5e   :  { %559 = vmatpush1.bf16.msra.mxu0 %v2733_v10  ;;  %602 = vmatpush1.bf16.msra.mxu1 %v2734_v11  ;;  %v2761_v29 = vld [vmem:[#allocation5 + $0xc] ss:$16 sps:$4 sm:$0xff]   ;;  %v2763_v30 = vld [vmem:[#allocation5] ss:$16 sps:$4 sm:$0xff]   ;;  %v2764_v31 = vld [vmem:[#allocation5 + $0x8] ss:$16 sps:$4 sm:$0xff]  }
  0x5f   :  { %560 = vmatprep.subr.bf16.mxu0 %v2735_v12  ;;  %603 = vmatprep.subr.bf16.mxu1 %v2737_v13  ;;  %v2765_v32 = vld [vmem:[#allocation5 + $0x1e4] ss:$16 sps:$4 sm:$0xff]   ;;  %v2767_v33 = vld [vmem:[#allocation5 + $0x1ec] ss:$16 sps:$4 sm:$0xff]   ;;  %v2769_v34 = vld [vmem:[#allocation5 + $0x1e0] ss:$16 sps:$4 sm:$0xff]  }
  0x60   :  { %v2770_v35 = vld [vmem:[#allocation5 + $0x1e8] ss:$16 sps:$4 sm:$0xff]   ;;  %v2771_v36 = vld [vmem:[#allocation5 + $0x1c4] ss:$16 sps:$4 sm:$0xff]   ;;  %v2773_v37 = vld [vmem:[#allocation5 + $0x1cc] ss:$16 sps:$4 sm:$0xff]  }
  0x61   :  { %v2775_v38 = vld [vmem:[#allocation5 + $0x1c0] ss:$16 sps:$4 sm:$0xff]   ;;  %v2776_v39 = vld [vmem:[#allocation5 + $0x1c8] ss:$16 sps:$4 sm:$0xff]   ;;  %v2777_v40 = vld [vmem:[#allocation5 + $0x1a4] ss:$16 sps:$4 sm:$0xff]  }
  0x62   :  { %561 = vmatpush1.bf16.msra.mxu0 %v2739_v14  ;;  %604 = vmatpush1.bf16.msra.mxu1 %v2740_v15  ;;  %v2779_v41 = vld [vmem:[#allocation5 + $0x1ac] ss:$16 sps:$4 sm:$0xff]   ;;  %v2781_v42 = vld [vmem:[#allocation5 + $0x1a0] ss:$16 sps:$4 sm:$0xff]   ;;  %v2782_v43 = vld [vmem:[#allocation5 + $0x1a8] ss:$16 sps:$4 sm:$0xff]  }
  0x63   :  { %562 = vmatprep.subr.bf16.mxu0 %v2741_v16  ;;  %605 = vmatprep.subr.bf16.mxu1 %v2743_v17  ;;  %v2783_v44 = vld [vmem:[#allocation5 + $0x184] ss:$16 sps:$4 sm:$0xff]   ;;  %v2785_v45 = vld [vmem:[#allocation5 + $0x18c] ss:$16 sps:$4 sm:$0xff]   ;;  %v2787_v48 = vld [vmem:[#allocation5 + $0x180] ss:$16 sps:$4 sm:$0xff]  }
  0x64   :  { %v132_v46 = vld [vmem:[#allocation2] sm:$0xff]  ;;  %v133_v47 = vld [vmem:[#allocation2 + $0x8] sm:$0xff]  ;;  %v2821_v10 = vld [vmem:[#allocation8 + $0x60] ss:$8 sps:$4 sm:$0xff]   ;;  %s3334_s17 = smov [#allocation14]  }
  0x65   :  { %v2788_v49 = vld [vmem:[#allocation5 + $0x188] ss:$16 sps:$4 sm:$0xff]   ;;  %v2416_v50 = vcombine.high %v132_v46, %v133_v47  ;;  %v2789_v51 = vld [vmem:[#allocation5 + $0x164] ss:$16 sps:$4 sm:$0xff]   ;;  %v2791_v52 = vld [vmem:[#allocation5 + $0x16c] ss:$16 sps:$4 sm:$0xff]   ;;  %v2415_v5 = vcombine.low %v132_v46, %v133_v47 }
  0x66   :  { %563 = vmatpush1.bf16.msra.mxu0 %v2745_v18  ;;  %606 = vmatpush1.bf16.msra.mxu1 %v2746_v19  ;;  %v2793_v53 = vld [vmem:[#allocation5 + $0x160] ss:$16 sps:$4 sm:$0xff]   ;;  %v2794_v54 = vld [vmem:[#allocation5 + $0x168] ss:$16 sps:$4 sm:$0xff]   ;;  %v2795_v55 = vld [vmem:[#allocation5 + $0x144] ss:$16 sps:$4 sm:$0xff]  }
  0x67   :  { %564 = vmatprep.subr.bf16.mxu0 %v2747_v20  ;;  %607 = vmatprep.subr.bf16.mxu1 %v2749_v21  ;;  %v2797_v56 = vld [vmem:[#allocation5 + $0x14c] ss:$16 sps:$4 sm:$0xff]   ;;  %v2799_v57 = vld [vmem:[#allocation5 + $0x140] ss:$16 sps:$4 sm:$0xff]   ;;  %v2800_v58 = vld [vmem:[#allocation5 + $0x148] ss:$16 sps:$4 sm:$0xff]  }
  0x68   :  { %586 = vmatprep.mubr.bf16.mxu0 %v2416_v50  ;;  %629 = vmatprep.mubr.bf16.mxu1 %v2416_v50  ;;  %v2801_v59 = vld [vmem:[#allocation5 + $0x124] ss:$16 sps:$4 sm:$0xff]   ;;  %v2803_v60 = vld [vmem:[#allocation5 + $0x12c] ss:$16 sps:$4 sm:$0xff]   ;;  %v2805_v61 = vld [vmem:[#allocation5 + $0x120] ss:$16 sps:$4 sm:$0xff]  }
  0x69   :  { %v2806_v62 = vld [vmem:[#allocation5 + $0x128] ss:$16 sps:$4 sm:$0xff]   ;;  %v2807_v63 = vld [vmem:[#allocation5 + $0x104] ss:$16 sps:$4 sm:$0xff]   ;;  %v2809_v0 = vld [vmem:[#allocation5 + $0x10c] ss:$16 sps:$4 sm:$0xff]  }
  0x6a   :  { %565 = vmatpush1.bf16.msra.mxu0 %v2751_v22  ;;  %608 = vmatpush1.bf16.msra.mxu1 %v2752_v23  ;;  %v2811_v1 = vld [vmem:[#allocation5 + $0x100] ss:$16 sps:$4 sm:$0xff]   ;;  %v2812_v2 = vld [vmem:[#allocation5 + $0x108] ss:$16 sps:$4 sm:$0xff]   ;;  %v2815_v6 = vld [vmem:[#allocation8 + $0x70] ss:$8 sps:$4 sm:$0xff]  }
  0x6b   :  { %566 = vmatprep.subr.bf16.mxu0 %v2753_v24  ;;  %609 = vmatprep.subr.bf16.mxu1 %v2755_v25  ;;  %v2817_v3 = vld [vmem:[#allocation8 + $0x74] ss:$8 sps:$4 sm:$0xff]   ;;  %v2818_v7 = vld [vmem:[#allocation8 + $0x170] ss:$8 sps:$4 sm:$0xff]   ;;  %v2823_v8 = vld [vmem:[#allocation8 + $0x64] ss:$8 sps:$4 sm:$0xff]  }
  0x6c   :  { %v2820_v4 = vld [vmem:[#allocation8 + $0x174] ss:$8 sps:$4 sm:$0xff]   ;;  %v2826_v9 = vld [vmem:[#allocation8 + $0x164] ss:$8 sps:$4 sm:$0xff]   ;;  %v2824_v11 = vld [vmem:[#allocation8 + $0x160] ss:$8 sps:$4 sm:$0xff]  }
  0x6d   :  { %v2829_v12 = vld [vmem:[#allocation8 + $0x54] ss:$8 sps:$4 sm:$0xff]   ;;  %v2827_v14 = vld [vmem:[#allocation8 + $0x50] ss:$8 sps:$4 sm:$0xff]   ;;  %v2835_v16 = vld [vmem:[#allocation8 + $0x44] ss:$8 sps:$4 sm:$0xff]  }
  0x6e   :  { %567 = vmatpush1.bf16.msra.mxu0 %v2757_v26  ;;  %610 = vmatpush1.bf16.msra.mxu1 %v2758_v27  ;;  %v2832_v13 = vld [vmem:[#allocation8 + $0x154] ss:$8 sps:$4 sm:$0xff]   ;;  %v2830_v15 = vld [vmem:[#allocation8 + $0x150] ss:$8 sps:$4 sm:$0xff]   ;;  %v2838_v17 = vld [vmem:[#allocation8 + $0x144] ss:$8 sps:$4 sm:$0xff]  }
  0x6f   :  { %568 = vmatprep.subr.bf16.mxu0 %v2759_v28  ;;  %611 = vmatprep.subr.bf16.mxu1 %v2761_v29  ;;  %v2833_v18 = vld [vmem:[#allocation8 + $0x40] ss:$8 sps:$4 sm:$0xff]   ;;  %v2841_v20 = vld [vmem:[#allocation8 + $0x34] ss:$8 sps:$4 sm:$0xff]   ;;  %v2839_v22 = vld [vmem:[#allocation8 + $0x30] ss:$8 sps:$4 sm:$0xff]  }
  0x70   :  { %v2836_v19 = vld [vmem:[#allocation8 + $0x140] ss:$8 sps:$4 sm:$0xff]   ;;  %v2844_v21 = vld [vmem:[#allocation8 + $0x134] ss:$8 sps:$4 sm:$0xff]   ;;  %v2842_v23 = vld [vmem:[#allocation8 + $0x130] ss:$8 sps:$4 sm:$0xff]  }
  0x71   :  { %v2847_v24 = vld [vmem:[#allocation8 + $0x24] ss:$8 sps:$4 sm:$0xff]   ;;  %v2845_v26 = vld [vmem:[#allocation8 + $0x20] ss:$8 sps:$4 sm:$0xff]   ;;  %v2853_v28 = vld [vmem:[#allocation8 + $0x14] ss:$8 sps:$4 sm:$0xff]  }
  0x72   :  { %569 = vmatpush1.bf16.msra.mxu0 %v2763_v30  ;;  %612 = vmatpush1.bf16.msra.mxu1 %v2764_v31  ;;  %v2850_v25 = vld [vmem:[#allocation8 + $0x124] ss:$8 sps:$4 sm:$0xff]   ;;  %v2848_v27 = vld [vmem:[#allocation8 + $0x120] ss:$8 sps:$4 sm:$0xff]   ;;  %v2856_v29 = vld [vmem:[#allocation8 + $0x114] ss:$8 sps:$4 sm:$0xff]  }
  0x73   :  { %570 = vmatprep.subr.bf16.mxu0 %v2765_v32  ;;  %613 = vmatprep.subr.bf16.mxu1 %v2767_v33  ;;  %v2851_v30 = vld [vmem:[#allocation8 + $0x10] ss:$8 sps:$4 sm:$0xff]   ;;  %v2859_v32 = vld [vmem:[#allocation8 + $0x4] ss:$8 sps:$4 sm:$0xff]   ;;  %v2881_v50 = vld [vmem:[#allocation8 + $0xc0] ss:$8 sps:$4 sm:$0xff]  }
  0x74   :  { %v2854_v31 = vld [vmem:[#allocation8 + $0x110] ss:$8 sps:$4 sm:$0xff]   ;;  %v2862_v33 = vld [vmem:[#allocation8 + $0x104] ss:$8 sps:$4 sm:$0xff]   ;;  %s2400_s18 = sshll.u32 %s3334_s17, 4  ;;  %s2401_s18 = int_to_ptr.vmem [resolvable:$true] %s2400_s18 }
  0x75   :  { %v2875_v46 = vld [vmem:[#allocation8 + $0xd0] ss:$8 sps:$4 sm:$0xff]   ;;  %p3298_p8 = scmp.lt.s32.totalorder %s2401_s18, %s2401_s18 }
  0x76   :  { %571 = vmatpush2.bf16.msra.mxu0 %v2769_v34  ;;  %614 = vmatpush2.bf16.msra.mxu1 %v2770_v35  ;;  %v2857_v34 = vld [vmem:[#allocation8] ss:$8 sps:$4 sm:$0xff]   ;;  %v2878_v47 = vld [vmem:[#allocation8 + $0x1d0] ss:$8 sps:$4 sm:$0xff]  }
  0x77   :  { %572 = vmatprep.subr.bf16.mxu0 %v2771_v36  ;;  %615 = vmatprep.subr.bf16.mxu1 %v2773_v37  ;;  %v2860_v35 = vld [vmem:[#allocation8 + $0x100] ss:$8 sps:$4 sm:$0xff]   ;;  %v2865_v36 = vld [vmem:[#allocation8 + $0xf4] ss:$8 sps:$4 sm:$0xff]  }
  0x78   :  { %v2868_v37 = vld [vmem:[#allocation8 + $0x1f4] ss:$8 sps:$4 sm:$0xff]  }
  0x7a   :  { %573 = vmatpush2.bf16.msra.mxu0 %v2775_v38  ;;  %616 = vmatpush2.bf16.msra.mxu1 %v2776_v39  ;;  %v2863_v38 = vld [vmem:[#allocation8 + $0xf0] ss:$8 sps:$4 sm:$0xff]  }
  0x7b   :  { %574 = vmatprep.subr.bf16.mxu0 %v2777_v40  ;;  %617 = vmatprep.subr.bf16.mxu1 %v2779_v41  ;;  %v2866_v39 = vld [vmem:[#allocation8 + $0x1f0] ss:$8 sps:$4 sm:$0xff]   ;;  %v2871_v40 = vld [vmem:[#allocation8 + $0xe4] ss:$8 sps:$4 sm:$0xff]  }
  0x7c   :  { %v2874_v41 = vld [vmem:[#allocation8 + $0x1e4] ss:$8 sps:$4 sm:$0xff]  }
  0x7e   :  { %575 = vmatpush2.bf16.msra.mxu0 %v2781_v42  ;;  %618 = vmatpush2.bf16.msra.mxu1 %v2782_v43  ;;  %v2869_v42 = vld [vmem:[#allocation8 + $0xe0] ss:$8 sps:$4 sm:$0xff]  }
  0x7f   :  { %576 = vmatprep.subr.bf16.mxu0 %v2783_v44  ;;  %619 = vmatprep.subr.bf16.mxu1 %v2785_v45  ;;  %v2872_v43 = vld [vmem:[#allocation8 + $0x1e0] ss:$8 sps:$4 sm:$0xff]   ;;  %v2877_v44 = vld [vmem:[#allocation8 + $0xd4] ss:$8 sps:$4 sm:$0xff]  }
  0x80   :  { %v2880_v45 = vld [vmem:[#allocation8 + $0x1d4] ss:$8 sps:$4 sm:$0xff]  }
  0x82   :  { %577 = vmatpush2.bf16.msra.mxu0 %v2787_v48  ;;  %620 = vmatpush2.bf16.msra.mxu1 %v2788_v49  ;;  %v2883_v48 = vld [vmem:[#allocation8 + $0xc4] ss:$8 sps:$4 sm:$0xff]  }
  0x83   :  { %578 = vmatprep.subr.bf16.mxu0 %v2789_v51  ;;  %621 = vmatprep.subr.bf16.mxu1 %v2791_v52  ;;  %v2886_v49 = vld [vmem:[#allocation8 + $0x1c4] ss:$8 sps:$4 sm:$0xff]   ;;  %v2884_v51 = vld [vmem:[#allocation8 + $0x1c0] ss:$8 sps:$4 sm:$0xff]   ;;  %v2889_v52 = vld [vmem:[#allocation8 + $0xb4] ss:$8 sps:$4 sm:$0xff]  }
  0x86   :  { %579 = vmatpush2.bf16.msra.mxu0 %v2793_v53  ;;  %622 = vmatpush2.bf16.msra.mxu1 %v2794_v54  ;;  %v2892_v53 = vld [vmem:[#allocation8 + $0x1b4] ss:$8 sps:$4 sm:$0xff]   ;;  %v2887_v54 = vld [vmem:[#allocation8 + $0xb0] ss:$8 sps:$4 sm:$0xff]  }
  0x87   :  { %580 = vmatprep.subr.bf16.mxu0 %v2795_v55  ;;  %623 = vmatprep.subr.bf16.mxu1 %v2797_v56  ;;  %v2890_v55 = vld [vmem:[#allocation8 + $0x1b0] ss:$8 sps:$4 sm:$0xff]   ;;  %v2895_v56 = vld [vmem:[#allocation8 + $0xa4] ss:$8 sps:$4 sm:$0xff]  }
  0x8a   :  { %581 = vmatpush2.bf16.msra.mxu0 %v2799_v57  ;;  %624 = vmatpush2.bf16.msra.mxu1 %v2800_v58  ;;  %v2898_v57 = vld [vmem:[#allocation8 + $0x1a4] ss:$8 sps:$4 sm:$0xff]   ;;  %v2893_v58 = vld [vmem:[#allocation8 + $0xa0] ss:$8 sps:$4 sm:$0xff]  }
  0x8b   :  { %582 = vmatprep.subr.bf16.mxu0 %v2801_v59  ;;  %625 = vmatprep.subr.bf16.mxu1 %v2803_v60  ;;  %v2896_v59 = vld [vmem:[#allocation8 + $0x1a0] ss:$8 sps:$4 sm:$0xff]   ;;  %v2901_v60 = vld [vmem:[#allocation8 + $0x94] ss:$8 sps:$4 sm:$0xff]  }
  0x8e   :  { %583 = vmatpush2.bf16.msra.mxu0 %v2805_v61  ;;  %626 = vmatpush2.bf16.msra.mxu1 %v2806_v62  ;;  %v2904_v61 = vld [vmem:[#allocation8 + $0x194] ss:$8 sps:$4 sm:$0xff]   ;;  %v2899_v62 = vld [vmem:[#allocation8 + $0x90] ss:$8 sps:$4 sm:$0xff]  }
  0x8f   :  { %584 = vmatprep.subr.bf16.mxu0 %v2807_v63  ;;  %627 = vmatprep.subr.bf16.mxu1 %v2809_v0  ;;  %v2902_v63 = vld [vmem:[#allocation8 + $0x190] ss:$8 sps:$4 sm:$0xff]   ;;  %v2907_v0 = vld [vmem:[#allocation8 + $0x84] ss:$8 sps:$4 sm:$0xff]  }
  0x92   :  { %585 = vmatpush2.bf16.msra.mxu0 %v2811_v1  ;;  %628 = vmatpush2.bf16.msra.mxu1 %v2812_v2  ;;  %v2910_v1 = vld [vmem:[#allocation8 + $0x184] ss:$8 sps:$4 sm:$0xff]   ;;  %v2905_v2 = vld [vmem:[#allocation8 + $0x80] ss:$8 sps:$4 sm:$0xff]  }
  0x93   :  { %1048 = vmatprep.subr.bf16.mxu0 %v2817_v3  ;;  %1091 = vmatprep.subr.bf16.mxu1 %v2820_v4  ;;  %v2908_v3 = vld [vmem:[#allocation8 + $0x180] ss:$8 sps:$4 sm:$0xff]   ;;  %v2913_v4 = vld [vmem:[#allocation10 + $0xe4] ss:$16 sps:$4 sm:$0xff]  }
  0x95   :  { %587 = vmatmul.mubr.bf16.vlgmr.msra.gmra.mxu0 %v2415_v5  ;;  %630 = vmatmul.mubr.bf16.vlgmr.msra.gmra.mxu1 %v2415_v5  ;;  %v2916_v5 = vld [vmem:[#allocation10 + $0xec] ss:$16 sps:$4 sm:$0xff]  }
  0x96   :  { %1049 = vmatpush1.bf16.msra.mxu0 %v2815_v6  ;;  %1092 = vmatpush1.bf16.msra.mxu1 %v2818_v7  ;;  %v204_v6 = vlaneseq }
  0x97   :  { %1050 = vmatprep.subr.bf16.mxu0 %v2823_v8  ;;  %1093 = vmatprep.subr.bf16.mxu1 %v2826_v9 }
  0x98   :  { %v3434_v7 = vshrl.u32 %v204_v6, 7  ;;  %v2950_v6 = vld [vmem:[#allocation10 + $0x28] ss:$16 sps:$4 sm:$0xff]  }
  0x9a   :  { %1051 = vmatpush1.bf16.msra.mxu0 %v2821_v10  ;;  %1094 = vmatpush1.bf16.msra.mxu1 %v2824_v11  ;;  %v3437_v8 = vsub.s32 1, %v3434_v7  ;;  %v218_v9 = vsub.s32 3, %v3434_v7  ;;  %v3441_v10 = vsub.s32 0, %v3434_v7  ;;  %v214_v11 = vsub.s32 2, %v3434_v7 }
  0x9b   :  { %1052 = vmatprep.subr.bf16.mxu0 %v2829_v12  ;;  %1095 = vmatprep.subr.bf16.mxu1 %v2832_v13  ;;  %v202_v12 = vld [vmem:[#allocation7] sm:$0xf] }
  0x9e   :  { %1053 = vmatpush1.bf16.msra.mxu0 %v2827_v14  ;;  %1096 = vmatpush1.bf16.msra.mxu1 %v2830_v15  ;;  %v211_v15 = vrot.slane %v202_v12, %v3437_v8 }
  0x9f   :  { %1054 = vmatprep.subr.bf16.mxu0 %v2835_v16  ;;  %1097 = vmatprep.subr.bf16.mxu1 %v2838_v17  ;;  %v219_v16 = vrot.slane %v202_v12, %v218_v9  ;;  %v207_v17 = vrot.slane %v202_v12, %v3441_v10 }
  0xa2   :  { %1055 = vmatpush1.bf16.msra.mxu0 %v2833_v18  ;;  %1098 = vmatpush1.bf16.msra.mxu1 %v2836_v19  ;;  %v215_v18 = vrot.slane %v202_v12, %v214_v11  ;;  %v2955_v12 = vld [vmem:[#allocation10 + $0x4] ss:$16 sps:$4 sm:$0xff]  }
  0xa3   :  { %1056 = vmatprep.subr.bf16.mxu0 %v2841_v20  ;;  %1099 = vmatprep.subr.bf16.mxu1 %v2844_v21 }
  0xa6   :  { %1057 = vmatpush1.bf16.msra.mxu0 %v2839_v22  ;;  %1100 = vmatpush1.bf16.msra.mxu1 %v2842_v23 }
  0xa7   :  { %1058 = vmatprep.subr.bf16.mxu0 %v2847_v24  ;;  %1101 = vmatprep.subr.bf16.mxu1 %v2850_v25 }
  0xaa   :  { %1059 = vmatpush1.bf16.msra.mxu0 %v2845_v26  ;;  %1102 = vmatpush1.bf16.msra.mxu1 %v2848_v27 }
  0xab   :  { %1060 = vmatprep.subr.bf16.mxu0 %v2853_v28  ;;  %1103 = vmatprep.subr.bf16.mxu1 %v2856_v29 }
  0xae   :  { %1061 = vmatpush1.bf16.msra.mxu0 %v2851_v30  ;;  %1104 = vmatpush1.bf16.msra.mxu1 %v2854_v31 }
  0xaf   :  { %1062 = vmatprep.subr.bf16.mxu0 %v2859_v32  ;;  %1105 = vmatprep.subr.bf16.mxu1 %v2862_v33 }
  0xb2   :  { %1063 = vmatpush1.bf16.msra.mxu0 %v2857_v34  ;;  %1106 = vmatpush1.bf16.msra.mxu1 %v2860_v35 }
  0xb3   :  { %1064 = vmatprep.subr.bf16.mxu0 %v2865_v36  ;;  %1107 = vmatprep.subr.bf16.mxu1 %v2868_v37 }
  0xb6   :  { %1065 = vmatpush2.bf16.msra.mxu0 %v2863_v38  ;;  %1108 = vmatpush2.bf16.msra.mxu1 %v2866_v39 }
  0xb7   :  { %1066 = vmatprep.subr.bf16.mxu0 %v2871_v40  ;;  %1109 = vmatprep.subr.bf16.mxu1 %v2874_v41 }
  0xba   :  { %1067 = vmatpush2.bf16.msra.mxu0 %v2869_v42  ;;  %1110 = vmatpush2.bf16.msra.mxu1 %v2872_v43  ;;  %v2911_v43 = vld [vmem:[#allocation10 + $0xe0] ss:$16 sps:$4 sm:$0xff]  }
  0xbb   :  { %1068 = vmatprep.subr.bf16.mxu0 %v2877_v44  ;;  %1111 = vmatprep.subr.bf16.mxu1 %v2880_v45  ;;  %v2914_v44 = vld [vmem:[#allocation10 + $0xe8] ss:$16 sps:$4 sm:$0xff]  }
  0xbe   :  { %1069 = vmatpush2.bf16.msra.mxu0 %v2875_v46  ;;  %1112 = vmatpush2.bf16.msra.mxu1 %v2878_v47  ;;  %v2919_v47 = vld [vmem:[#allocation10 + $0xc4] ss:$16 sps:$4 sm:$0xff]  }
  0xbf   :  { %1070 = vmatprep.subr.bf16.mxu0 %v2883_v48  ;;  %1113 = vmatprep.subr.bf16.mxu1 %v2886_v49  ;;  %v2922_v48 = vld [vmem:[#allocation10 + $0xcc] ss:$16 sps:$4 sm:$0xff]   ;;  %v2917_v49 = vld [vmem:[#allocation10 + $0xc0] ss:$16 sps:$4 sm:$0xff]  }
  0xc2   :  { %1071 = vmatpush2.bf16.msra.mxu0 %v2881_v50  ;;  %1114 = vmatpush2.bf16.msra.mxu1 %v2884_v51  ;;  %v2920_v50 = vld [vmem:[#allocation10 + $0xc8] ss:$16 sps:$4 sm:$0xff]   ;;  %v2925_v51 = vld [vmem:[#allocation10 + $0xa4] ss:$16 sps:$4 sm:$0xff]  }
  0xc3   :  { %1072 = vmatprep.subr.bf16.mxu0 %v2889_v52  ;;  %1115 = vmatprep.subr.bf16.mxu1 %v2892_v53  ;;  %v2928_v52 = vld [vmem:[#allocation10 + $0xac] ss:$16 sps:$4 sm:$0xff]   ;;  %v2923_v53 = vld [vmem:[#allocation10 + $0xa0] ss:$16 sps:$4 sm:$0xff]  }
  0xc6   :  { %1073 = vmatpush2.bf16.msra.mxu0 %v2887_v54  ;;  %1116 = vmatpush2.bf16.msra.mxu1 %v2890_v55  ;;  %v2926_v54 = vld [vmem:[#allocation10 + $0xa8] ss:$16 sps:$4 sm:$0xff]   ;;  %v2931_v55 = vld [vmem:[#allocation10 + $0x84] ss:$16 sps:$4 sm:$0xff]  }
  0xc7   :  { %1074 = vmatprep.subr.bf16.mxu0 %v2895_v56  ;;  %1117 = vmatprep.subr.bf16.mxu1 %v2898_v57  ;;  %v2934_v56 = vld [vmem:[#allocation10 + $0x8c] ss:$16 sps:$4 sm:$0xff]   ;;  %v2929_v57 = vld [vmem:[#allocation10 + $0x80] ss:$16 sps:$4 sm:$0xff]  }
  0xca   :  { %1075 = vmatpush2.bf16.msra.mxu0 %v2893_v58  ;;  %1118 = vmatpush2.bf16.msra.mxu1 %v2896_v59  ;;  %v2932_v58 = vld [vmem:[#allocation10 + $0x88] ss:$16 sps:$4 sm:$0xff]   ;;  %v2937_v59 = vld [vmem:[#allocation10 + $0x64] ss:$16 sps:$4 sm:$0xff]  }
  0xcb   :  { %1076 = vmatprep.subr.bf16.mxu0 %v2901_v60  ;;  %1119 = vmatprep.subr.bf16.mxu1 %v2904_v61  ;;  %v2940_v60 = vld [vmem:[#allocation10 + $0x6c] ss:$16 sps:$4 sm:$0xff]   ;;  %v2935_v61 = vld [vmem:[#allocation10 + $0x60] ss:$16 sps:$4 sm:$0xff]  }
  0xce   :  { %1077 = vmatpush2.bf16.msra.mxu0 %v2899_v62  ;;  %1120 = vmatpush2.bf16.msra.mxu1 %v2902_v63  ;;  %v2938_v62 = vld [vmem:[#allocation10 + $0x68] ss:$16 sps:$4 sm:$0xff]   ;;  %v2943_v63 = vld [vmem:[#allocation10 + $0x44] ss:$16 sps:$4 sm:$0xff]  }
  0xcf   :  { %1078 = vmatprep.subr.bf16.mxu0 %v2907_v0  ;;  %1121 = vmatprep.subr.bf16.mxu1 %v2910_v1  ;;  %v2946_v0 = vld [vmem:[#allocation10 + $0x4c] ss:$16 sps:$4 sm:$0xff]   ;;  %v2941_v1 = vld [vmem:[#allocation10 + $0x40] ss:$16 sps:$4 sm:$0xff]  }
  0xd2   :  { %1079 = vmatpush2.bf16.msra.mxu0 %v2905_v2  ;;  %1122 = vmatpush2.bf16.msra.mxu1 %v2908_v3  ;;  %v2944_v2 = vld [vmem:[#allocation10 + $0x48] ss:$16 sps:$4 sm:$0xff]   ;;  %v2949_v3 = vld [vmem:[#allocation10 + $0x24] ss:$16 sps:$4 sm:$0xff]  }
  0xd3   :  { %1550 = vmatprep.subr.bf16.mxu0 %v2913_v4  ;;  %1593 = vmatprep.subr.bf16.mxu1 %v2916_v5  ;;  %v2952_v4 = vld [vmem:[#allocation10 + $0x2c] ss:$16 sps:$4 sm:$0xff]   ;;  %v2947_v5 = vld [vmem:[#allocation10 + $0x20] ss:$16 sps:$4 sm:$0xff]  }
 0x155   :  { %v588_v13 = vpop.f32.mrf.mxu0  ;;  %v631_v14 = vpop.f32.mrf.mxu1 }
 0x156   :  { %v589_v27 = vadd.f32 %v588_v13, %v207_v17  ;;  %v632_v28 = vadd.f32 %v631_v14, %v215_v18  ;;  %v2958_v13 = vld [vmem:[#allocation10 + $0xc] ss:$16 sps:$4 sm:$0xff]   ;;  %v2953_v14 = vld [vmem:[#allocation10] ss:$16 sps:$4 sm:$0xff]  }
 0x157   :  { %v590_v19 = vpop.f32.mrf.mxu0  ;;  %v633_v20 = vpop.f32.mrf.mxu1 }
 0x158   :  { %v591_v23 = vadd.f32 %v590_v19, %v211_v15  ;;  %v634_v24 = vadd.f32 %v633_v20, %v219_v16  ;;  %v640_v39 = vmax.f32 %v589_v27, 0.0  ;;  %v642_v40 = vmax.f32 %v632_v28, 0.0  ;;  %v2962_v19 = vld [vmem:[#allocation10 + $0x1e8] ss:$16 sps:$4 sm:$0xff]   ;;  %v2967_v20 = vld [vmem:[#allocation10 + $0x1c4] ss:$16 sps:$4 sm:$0xff]  }
 0x159   :  { %v592_v21 = vpop.f32.mrf.mxu0  ;;  %v635_v22 = vpop.f32.mrf.mxu1  ;;  %v2974_v27 = vld [vmem:[#allocation10 + $0x1a8] ss:$16 sps:$4 sm:$0xff]   ;;  %v2979_v28 = vld [vmem:[#allocation10 + $0x184] ss:$16 sps:$4 sm:$0xff]  }
 0x15a   :  { %v593_v25 = vadd.f32 %v592_v21, %v207_v17  ;;  %v636_v26 = vadd.f32 %v635_v22, %v215_v18  ;;  %v641_v35 = vmax.f32 %v591_v23, 0.0  ;;  %v643_v36 = vmax.f32 %v634_v24, 0.0  ;;  %v2964_v17 = vld [vmem:[#allocation10 + $0x1ec] ss:$16 sps:$4 sm:$0xff]   ;;  %v2959_v18 = vld [vmem:[#allocation10 + $0x1e0] ss:$16 sps:$4 sm:$0xff]  }
 0x15b   :  { %v594_v29 = vpop.f32.mrf.mxu0  ;;  %v637_v30 = vpop.f32.mrf.mxu1  ;;  %v2970_v21 = vld [vmem:[#allocation10 + $0x1cc] ss:$16 sps:$4 sm:$0xff]   ;;  %v2965_v22 = vld [vmem:[#allocation10 + $0x1c0] ss:$16 sps:$4 sm:$0xff]   ;;  %v2968_v23 = vld [vmem:[#allocation10 + $0x1c8] ss:$16 sps:$4 sm:$0xff]  }
 0x15c   :  { %v595_v31 = vadd.f32 %v594_v29, %v211_v15  ;;  %v638_v32 = vadd.f32 %v637_v30, %v219_v16  ;;  %v644_v33 = vmax.f32 %v593_v25, 0.0  ;;  %v646_v34 = vmax.f32 %v636_v26, 0.0  ;;  %v2956_v15 = vld [vmem:[#allocation10 + $0x8] ss:$16 sps:$4 sm:$0xff]   ;;  %v2961_v16 = vld [vmem:[#allocation10 + $0x1e4] ss:$16 sps:$4 sm:$0xff]  }
 0x15d   :  { %v2973_v24 = vld [vmem:[#allocation10 + $0x1a4] ss:$16 sps:$4 sm:$0xff]   ;;  %v2976_v25 = vld [vmem:[#allocation10 + $0x1ac] ss:$16 sps:$4 sm:$0xff]   ;;  %v2971_v26 = vld [vmem:[#allocation10 + $0x1a0] ss:$16 sps:$4 sm:$0xff]  }
 0x15e   :  { %v645_v37 = vmax.f32 %v595_v31, 0.0  ;;  %v647_v38 = vmax.f32 %v638_v32, 0.0  ;;  %v648_v45 = vpack.c.bf16 %v644_v33, %v640_v39  ;;  %v650_v46 = vpack.c.bf16 %v646_v34, %v642_v40  ;;  %v2982_v29 = vld [vmem:[#allocation10 + $0x18c] ss:$16 sps:$4 sm:$0xff]   ;;  %v2977_v30 = vld [vmem:[#allocation10 + $0x180] ss:$16 sps:$4 sm:$0xff]  }
 0x15f   :  { %v2980_v31 = vld [vmem:[#allocation10 + $0x188] ss:$16 sps:$4 sm:$0xff]   ;;  %v2985_v32 = vld [vmem:[#allocation10 + $0x164] ss:$16 sps:$4 sm:$0xff]   ;;  %v2988_v33 = vld [vmem:[#allocation10 + $0x16c] ss:$16 sps:$4 sm:$0xff]  }
 0x160   :  { %v649_v41 = vpack.c.bf16 %v645_v37, %v641_v35  ;;  %v651_v42 = vpack.c.bf16 %v647_v38, %v643_v36  ;;  %v2983_v34 = vld [vmem:[#allocation10 + $0x160] ss:$16 sps:$4 sm:$0xff]   ;;  %v2986_v35 = vld [vmem:[#allocation10 + $0x168] ss:$16 sps:$4 sm:$0xff]   ;;  %v2991_v36 = vld [vmem:[#allocation10 + $0x144] ss:$16 sps:$4 sm:$0xff]  }
 0x161   :  { %v2994_v37 = vld [vmem:[#allocation10 + $0x14c] ss:$16 sps:$4 sm:$0xff]   ;;  %v2989_v38 = vld [vmem:[#allocation10 + $0x140] ss:$16 sps:$4 sm:$0xff]   ;;  %v2992_v39 = vld [vmem:[#allocation10 + $0x148] ss:$16 sps:$4 sm:$0xff]  }
 0x162   :  { %1080 = vmatprep.mubr.bf16.mxu0 %v649_v41  ;;  %1123 = vmatprep.mubr.bf16.mxu1 %v651_v42  ;;  %v2997_v40 = vld [vmem:[#allocation10 + $0x124] ss:$16 sps:$4 sm:$0xff]   ;;  %v3000_v41 = vld [vmem:[#allocation10 + $0x12c] ss:$16 sps:$4 sm:$0xff]   ;;  %v2995_v42 = vld [vmem:[#allocation10 + $0x120] ss:$16 sps:$4 sm:$0xff]  }
 0x163   :  { %1081 = vmatmul.mubr.bf16.vlgmr.msra.gmra.mxu0 %v648_v45  ;;  %1124 = vmatmul.mubr.bf16.vlgmr.msra.gmra.mxu1 %v650_v46  ;;  %v3006_v45 = vld [vmem:[#allocation10 + $0x10c] ss:$16 sps:$4 sm:$0xff]   ;;  %v3001_v46 = vld [vmem:[#allocation10 + $0x100] ss:$16 sps:$4 sm:$0xff]  }
 0x164   :  { %1551 = vmatpush1.bf16.msra.mxu0 %v2911_v43  ;;  %1594 = vmatpush1.bf16.msra.mxu1 %v2914_v44  ;;  %v2998_v43 = vld [vmem:[#allocation10 + $0x128] ss:$16 sps:$4 sm:$0xff]   ;;  %v3003_v44 = vld [vmem:[#allocation10 + $0x104] ss:$16 sps:$4 sm:$0xff]  }
 0x165   :  { %1552 = vmatprep.subr.bf16.mxu0 %v2919_v47  ;;  %1595 = vmatprep.subr.bf16.mxu1 %v2922_v48  ;;  %v3004_v47 = vld [vmem:[#allocation10 + $0x108] ss:$16 sps:$4 sm:$0xff]   ;;  %v3009_v48 = vld [vmem:[#allocation11 + $0x74] ss:$8 sps:$4 sm:$0xff]  }
 0x168   :  { %1553 = vmatpush1.bf16.msra.mxu0 %v2917_v49  ;;  %1596 = vmatpush1.bf16.msra.mxu1 %v2920_v50  ;;  %v3012_v49 = vld [vmem:[#allocation11 + $0x174] ss:$8 sps:$4 sm:$0xff]   ;;  %v716_v50 = vld [vmem:[%s3512_s4] sm:$0x3] }
 0x169   :  { %1554 = vmatprep.subr.bf16.mxu0 %v2925_v51  ;;  %1597 = vmatprep.subr.bf16.mxu1 %v2928_v52  ;;  %v721_v51 = vrot.slane %v716_v50, %v3441_v10  ;;  %v725_v52 = vrot.slane %v716_v50, %v3437_v8  ;;  %v3043_v50 = vld [vmem:[#allocation11 + $0x10] ss:$8 sps:$4 sm:$0xff]  }
 0x16c   :  { %1555 = vmatpush1.bf16.msra.mxu0 %v2923_v53  ;;  %1598 = vmatpush1.bf16.msra.mxu1 %v2926_v54 }
 0x16d   :  { %1556 = vmatprep.subr.bf16.mxu0 %v2931_v55  ;;  %1599 = vmatprep.subr.bf16.mxu1 %v2934_v56 }
 0x170   :  { %1557 = vmatpush1.bf16.msra.mxu0 %v2929_v57  ;;  %1600 = vmatpush1.bf16.msra.mxu1 %v2932_v58 }
 0x171   :  { %1558 = vmatprep.subr.bf16.mxu0 %v2937_v59  ;;  %1601 = vmatprep.subr.bf16.mxu1 %v2940_v60 }
 0x174   :  { %1559 = vmatpush1.bf16.msra.mxu0 %v2935_v61  ;;  %1602 = vmatpush1.bf16.msra.mxu1 %v2938_v62  ;;  %v3151_v61 = vld [vmem:[#allocation2] sm:$0xff] }
 0x175   :  { %1560 = vmatprep.subr.bf16.mxu0 %v2943_v63  ;;  %1603 = vmatprep.subr.bf16.mxu1 %v2946_v0  ;;  %v135_v62 = vunpack.c.h.bf16 %v3151_v61 }
 0x178   :  { %1561 = vmatpush1.bf16.msra.mxu0 %v2941_v1  ;;  %1604 = vmatpush1.bf16.msra.mxu1 %v2944_v2  ;;  %v3152_v1 = vld [vmem:[#allocation2 + $0x8] sm:$0xff] }
 0x179   :  { %1562 = vmatprep.subr.bf16.mxu0 %v2949_v3  ;;  %1605 = vmatprep.subr.bf16.mxu1 %v2952_v4  ;;  %v136_v2 = vunpack.c.l.bf16 %v3152_v1  ;;  %v134_v3 = vunpack.c.l.bf16 %v3151_v61  ;;  %v3066_v61 = vld [vmem:[#allocation11 + $0x1e4] ss:$8 sps:$4 sm:$0xff]  }
 0x17c   :  { %1563 = vmatpush1.bf16.msra.mxu0 %v2947_v5  ;;  %1606 = vmatpush1.bf16.msra.mxu1 %v2950_v6 }
 0x17d   :  { %1564 = vmatprep.subr.bf16.mxu0 %v2955_v12  ;;  %1607 = vmatprep.subr.bf16.mxu1 %v2958_v13  ;;  %v137_v13 = vunpack.c.h.bf16 %v3152_v1  ;;  %v3072_v1 = vld [vmem:[#allocation11 + $0x1d4] ss:$8 sps:$4 sm:$0xff]  }
 0x180   :  { %1565 = vmatpush1.bf16.msra.mxu0 %v2953_v14  ;;  %1608 = vmatpush1.bf16.msra.mxu1 %v2956_v15 }
 0x181   :  { %1566 = vmatprep.subr.bf16.mxu0 %v2961_v16  ;;  %1609 = vmatprep.subr.bf16.mxu1 %v2964_v17 }
 0x184   :  { %1567 = vmatpush2.bf16.msra.mxu0 %v2959_v18  ;;  %1610 = vmatpush2.bf16.msra.mxu1 %v2962_v19 }
 0x185   :  { %1568 = vmatprep.subr.bf16.mxu0 %v2967_v20  ;;  %1611 = vmatprep.subr.bf16.mxu1 %v2970_v21 }
 0x188   :  { %1569 = vmatpush2.bf16.msra.mxu0 %v2965_v22  ;;  %1612 = vmatpush2.bf16.msra.mxu1 %v2968_v23 }
 0x189   :  { %1570 = vmatprep.subr.bf16.mxu0 %v2973_v24  ;;  %1613 = vmatprep.subr.bf16.mxu1 %v2976_v25  ;;  %v3007_v25 = vld [vmem:[#allocation11 + $0x70] ss:$8 sps:$4 sm:$0xff]  }
 0x18c   :  { %1571 = vmatpush2.bf16.msra.mxu0 %v2971_v26  ;;  %1614 = vmatpush2.bf16.msra.mxu1 %v2974_v27  ;;  %v3010_v26 = vld [vmem:[#allocation11 + $0x170] ss:$8 sps:$4 sm:$0xff]  }
 0x18d   :  { %1572 = vmatprep.subr.bf16.mxu0 %v2979_v28  ;;  %1615 = vmatprep.subr.bf16.mxu1 %v2982_v29  ;;  %v3015_v28 = vld [vmem:[#allocation11 + $0x64] ss:$8 sps:$4 sm:$0xff]  }
 0x18e   :  { %v3018_v29 = vld [vmem:[#allocation11 + $0x164] ss:$8 sps:$4 sm:$0xff]  }
 0x190   :  { %1573 = vmatpush2.bf16.msra.mxu0 %v2977_v30  ;;  %1616 = vmatpush2.bf16.msra.mxu1 %v2980_v31  ;;  %v3013_v30 = vld [vmem:[#allocation11 + $0x60] ss:$8 sps:$4 sm:$0xff]  }
 0x191   :  { %1574 = vmatprep.subr.bf16.mxu0 %v2985_v32  ;;  %1617 = vmatprep.subr.bf16.mxu1 %v2988_v33  ;;  %v3016_v31 = vld [vmem:[#allocation11 + $0x160] ss:$8 sps:$4 sm:$0xff]   ;;  %v3021_v32 = vld [vmem:[#allocation11 + $0x54] ss:$8 sps:$4 sm:$0xff]  }
 0x192   :  { %v3024_v33 = vld [vmem:[#allocation11 + $0x154] ss:$8 sps:$4 sm:$0xff]  }
 0x194   :  { %1575 = vmatpush2.bf16.msra.mxu0 %v2983_v34  ;;  %1618 = vmatpush2.bf16.msra.mxu1 %v2986_v35  ;;  %v3019_v34 = vld [vmem:[#allocation11 + $0x50] ss:$8 sps:$4 sm:$0xff]  }
 0x195   :  { %1576 = vmatprep.subr.bf16.mxu0 %v2991_v36  ;;  %1619 = vmatprep.subr.bf16.mxu1 %v2994_v37  ;;  %v3022_v35 = vld [vmem:[#allocation11 + $0x150] ss:$8 sps:$4 sm:$0xff]   ;;  %v3027_v36 = vld [vmem:[#allocation11 + $0x44] ss:$8 sps:$4 sm:$0xff]  }
 0x196   :  { %v3030_v37 = vld [vmem:[#allocation11 + $0x144] ss:$8 sps:$4 sm:$0xff]  }
 0x198   :  { %1577 = vmatpush2.bf16.msra.mxu0 %v2989_v38  ;;  %1620 = vmatpush2.bf16.msra.mxu1 %v2992_v39  ;;  %v3025_v38 = vld [vmem:[#allocation11 + $0x40] ss:$8 sps:$4 sm:$0xff]  }
 0x199   :  { %1578 = vmatprep.subr.bf16.mxu0 %v2997_v40  ;;  %1621 = vmatprep.subr.bf16.mxu1 %v3000_v41  ;;  %v3028_v39 = vld [vmem:[#allocation11 + $0x140] ss:$8 sps:$4 sm:$0xff]   ;;  %v3033_v40 = vld [vmem:[#allocation11 + $0x34] ss:$8 sps:$4 sm:$0xff]  }
 0x19a   :  { %v3036_v41 = vld [vmem:[#allocation11 + $0x134] ss:$8 sps:$4 sm:$0xff]  }
 0x19c   :  { %1579 = vmatpush2.bf16.msra.mxu0 %v2995_v42  ;;  %1622 = vmatpush2.bf16.msra.mxu1 %v2998_v43  ;;  %v3031_v42 = vld [vmem:[#allocation11 + $0x30] ss:$8 sps:$4 sm:$0xff]  }
 0x19d   :  { %1580 = vmatprep.subr.bf16.mxu0 %v3003_v44  ;;  %1623 = vmatprep.subr.bf16.mxu1 %v3006_v45  ;;  %v3034_v43 = vld [vmem:[#allocation11 + $0x130] ss:$8 sps:$4 sm:$0xff]   ;;  %v3039_v44 = vld [vmem:[#allocation11 + $0x24] ss:$8 sps:$4 sm:$0xff]  }
 0x19e   :  { %v3042_v45 = vld [vmem:[#allocation11 + $0x124] ss:$8 sps:$4 sm:$0xff]  }
 0x1a0   :  { %1581 = vmatpush2.bf16.msra.mxu0 %v3001_v46  ;;  %1624 = vmatpush2.bf16.msra.mxu1 %v3004_v47  ;;  %v3037_v46 = vld [vmem:[#allocation11 + $0x20] ss:$8 sps:$4 sm:$0xff]  }
 0x1a1   :  { %2044 = vmatprep.subr.bf16.mxu0 %v3009_v48  ;;  %2087 = vmatprep.subr.bf16.mxu1 %v3012_v49  ;;  %v3040_v47 = vld [vmem:[#allocation11 + $0x120] ss:$8 sps:$4 sm:$0xff]   ;;  %v3045_v48 = vld [vmem:[#allocation11 + $0x14] ss:$8 sps:$4 sm:$0xff]  }
 0x1a2   :  { %v3048_v49 = vld [vmem:[#allocation11 + $0x114] ss:$8 sps:$4 sm:$0xff]  }
 0x223   :  { %v1082_v53 = vpop.f32.mrf.mxu0  ;;  %v1125_v54 = vpop.f32.mrf.mxu1 }
 0x224   :  { %v1083_v55 = vadd.f32 %v1082_v53, %v721_v51  ;;  %v3054_v53 = vld [vmem:[#allocation11 + $0x104] ss:$8 sps:$4 sm:$0xff]  }
 0x225   :  { %v1084_v56 = vpop.f32.mrf.mxu0  ;;  %v1127_v57 = vpop.f32.mrf.mxu1 }
 0x226   :  { %v1085_v58 = vadd.f32 %v1084_v56, %v725_v52  ;;  %v1126_v4 = vadd.f32 %v1125_v54, %v1083_v55  ;;  %v3049_v54 = vld [vmem:[#allocation11] ss:$8 sps:$4 sm:$0xff]   ;;  %v3057_v56 = vld [vmem:[#allocation11 + $0xf4] ss:$8 sps:$4 sm:$0xff]  }
 0x227   :  { %v1086_v59 = vpop.f32.mrf.mxu0  ;;  %v1129_v60 = vpop.f32.mrf.mxu1  ;;  %v3052_v55 = vld [vmem:[#allocation11 + $0x100] ss:$8 sps:$4 sm:$0xff]  }
 0x228   :  { %v1128_v63 = vadd.f32 %v1127_v57, %v1085_v58  ;;  %v1087_v0 = vadd.f32 %v1086_v59, %v721_v51  ;;  %v3459_v18 = vadd.f32 %v1126_v4, %v134_v3  ;;  %v3046_v51 = vld [vmem:[#allocation11 + $0x110] ss:$8 sps:$4 sm:$0xff]   ;;  %v3060_v57 = vld [vmem:[#allocation11 + $0x1f4] ss:$8 sps:$4 sm:$0xff]   ;;  %v3075_v4 = vld [vmem:[#allocation11 + $0xc4] ss:$8 sps:$4 sm:$0xff]  }
 0x229   :  { %v1088_v5 = vpop.f32.mrf.mxu0  ;;  %v1131_v14 = vpop.f32.mrf.mxu1  ;;  %v3055_v58 = vld [vmem:[#allocation11 + $0xf0] ss:$8 sps:$4 sm:$0xff]  }
 0x22a   :  { %v1130_v6 = vadd.f32 %v1129_v60, %v1087_v0  ;;  %v1089_v12 = vadd.f32 %v1088_v5, %v725_v52  ;;  %v3455_v15 = vadd.f32 %v1128_v63, %v135_v62  ;;  %v1138_v23 = vmax.f32 %v3459_v18, 0.0  ;;  %v3051_v52 = vld [vmem:[#allocation11 + $0x4] ss:$8 sps:$4 sm:$0xff]   ;;  %v3058_v59 = vld [vmem:[#allocation11 + $0x1f0] ss:$8 sps:$4 sm:$0xff]  }
 0x22b   :  { %v3063_v60 = vld [vmem:[#allocation11 + $0xe4] ss:$8 sps:$4 sm:$0xff]   ;;  %v3061_v62 = vld [vmem:[#allocation11 + $0xe0] ss:$8 sps:$4 sm:$0xff]   ;;  %v3069_v0 = vld [vmem:[#allocation11 + $0xd4] ss:$8 sps:$4 sm:$0xff]  }
 0x22c   :  { %v3457_v16 = vadd.f32 %v1130_v6, %v136_v2  ;;  %v1132_v17 = vadd.f32 %v1131_v14, %v1089_v12  ;;  %v1139_v21 = vmax.f32 %v3455_v15, 0.0  ;;  %v3064_v63 = vld [vmem:[#allocation11 + $0x1e0] ss:$8 sps:$4 sm:$0xff]   ;;  %v3067_v2 = vld [vmem:[#allocation11 + $0xd0] ss:$8 sps:$4 sm:$0xff]  }
 0x22d   :  { %v3070_v3 = vld [vmem:[#allocation11 + $0x1d0] ss:$8 sps:$4 sm:$0xff]   ;;  %v3078_v5 = vld [vmem:[#allocation11 + $0x1c4] ss:$8 sps:$4 sm:$0xff]   ;;  %v3073_v6 = vld [vmem:[#allocation11 + $0xc0] ss:$8 sps:$4 sm:$0xff]  }
 0x22e   :  { %v3461_v19 = vadd.f32 %v1132_v17, %v137_v13  ;;  %v1140_v20 = vmax.f32 %v3457_v16, 0.0  ;;  %v3076_v12 = vld [vmem:[#allocation11 + $0x1c0] ss:$8 sps:$4 sm:$0xff]   ;;  %v3081_v13 = vld [vmem:[#allocation11 + $0xb4] ss:$8 sps:$4 sm:$0xff]  }
 0x22f   :  { %v3084_v14 = vld [vmem:[#allocation11 + $0x1b4] ss:$8 sps:$4 sm:$0xff]   ;;  %v3079_v17 = vld [vmem:[#allocation11 + $0xb0] ss:$8 sps:$4 sm:$0xff]   ;;  %v2172_v15 = vld [vmem:[%s3518_s10] sm:$0x3] }
 0x230   :  { %v1141_v22 = vmax.f32 %v3461_v19, 0.0  ;;  %v1142_v27 = vpack.c.bf16 %v1140_v20, %v1138_v23  ;;  %v2177_v16 = vrot.slane %v2172_v15, %v3441_v10  ;;  %v2181_v18 = vrot.slane %v2172_v15, %v3437_v8  ;;  %s3293_s10 = scalar_lea.vmem %s2401_s18, 512 }
 0x231   :  { %p3294_p7 = scmp.ne.s32.totalorder %s2401_s18, %s3293_s10  ;;  %p3299_p9 = scmp.lt.s32.totalorder %s3293_s10, %s3293_s10 }
 0x232   :  { %v1143_v24 = vpack.c.bf16 %v1141_v22, %v1139_v21 }
 0x233   :  { %p3300_p10 = por %p3299_p9, %p3298_p8 }
 0x234   :  { %1582 = vmatprep.mubr.bf16.mxu0 %v1143_v24  ;;  %1625 = vmatprep.mubr.bf16.mxu1 %v1143_v24  ;;  %v3082_v24 = vld [vmem:[#allocation11 + $0x1b0] ss:$8 sps:$4 sm:$0xff]  }
 0x235   :  { %1583 = vmatmul.mubr.bf16.vlgmr.msra.gmra.mxu0 %v1142_v27  ;;  %1626 = vmatmul.mubr.bf16.vlgmr.msra.gmra.mxu1 %v1142_v27  ;;  %v3085_v27 = vld [vmem:[#allocation11 + $0xa0] ss:$8 sps:$4 sm:$0xff]   ;;  %p3301_p11 = pnand %p3300_p10, %p3294_p7 }
 0x236   :  { %2045 = vmatpush1.bf16.msra.mxu0 %v3007_v25  ;;  %2088 = vmatpush1.bf16.msra.mxu1 %v3010_v26  ;;  %v3087_v25 = vld [vmem:[#allocation11 + $0xa4] ss:$8 sps:$4 sm:$0xff]  }
 0x237   :  { %2046 = vmatprep.subr.bf16.mxu0 %v3015_v28  ;;  %2089 = vmatprep.subr.bf16.mxu1 %v3018_v29  ;;  %v3090_v26 = vld [vmem:[#allocation11 + $0x1a4] ss:$8 sps:$4 sm:$0xff]   ;;  %v3088_v28 = vld [vmem:[#allocation11 + $0x1a0] ss:$8 sps:$4 sm:$0xff]   ;;  %v3093_v29 = vld [vmem:[#allocation11 + $0x94] ss:$8 sps:$4 sm:$0xff]  }
 0x23a   :  { %2047 = vmatpush1.bf16.msra.mxu0 %v3013_v30  ;;  %2090 = vmatpush1.bf16.msra.mxu1 %v3016_v31  ;;  %v3096_v30 = vld [vmem:[#allocation11 + $0x194] ss:$8 sps:$4 sm:$0xff]   ;;  %v3091_v31 = vld [vmem:[#allocation11 + $0x90] ss:$8 sps:$4 sm:$0xff]  }
 0x23b   :  { %2048 = vmatprep.subr.bf16.mxu0 %v3021_v32  ;;  %2091 = vmatprep.subr.bf16.mxu1 %v3024_v33  ;;  %v3094_v32 = vld [vmem:[#allocation11 + $0x190] ss:$8 sps:$4 sm:$0xff]   ;;  %v3099_v33 = vld [vmem:[#allocation11 + $0x84] ss:$8 sps:$4 sm:$0xff]  }
 0x23e   :  { %2049 = vmatpush1.bf16.msra.mxu0 %v3019_v34  ;;  %2092 = vmatpush1.bf16.msra.mxu1 %v3022_v35  ;;  %v3102_v34 = vld [vmem:[#allocation11 + $0x184] ss:$8 sps:$4 sm:$0xff]   ;;  %v3097_v35 = vld [vmem:[#allocation11 + $0x80] ss:$8 sps:$4 sm:$0xff]  }
 0x23f   :  { %2050 = vmatprep.subr.bf16.mxu0 %v3027_v36  ;;  %2093 = vmatprep.subr.bf16.mxu1 %v3030_v37  ;;  %v3100_v36 = vld [vmem:[#allocation11 + $0x180] ss:$8 sps:$4 sm:$0xff]   ;;  %v3105_v37 = vld [vmem:[#allocation13 + $0x74] ss:$8 sps:$4 sm:$0xff]  }
 0x242   :  { %2051 = vmatpush1.bf16.msra.mxu0 %v3025_v38  ;;  %2094 = vmatpush1.bf16.msra.mxu1 %v3028_v39  ;;  %v1208_v38 = vld [vmem:[%s3514_s6] sm:$0xf] }
 0x243   :  { %2052 = vmatprep.subr.bf16.mxu0 %v3033_v40  ;;  %2095 = vmatprep.subr.bf16.mxu1 %v3036_v41  ;;  %v1217_v41 = vrot.slane %v1208_v38, %v3437_v8 }
 0x246   :  { %2053 = vmatpush1.bf16.msra.mxu0 %v3031_v42  ;;  %2096 = vmatpush1.bf16.msra.mxu1 %v3034_v43  ;;  %v1225_v42 = vrot.slane %v1208_v38, %v218_v9  ;;  %v1213_v43 = vrot.slane %v1208_v38, %v3441_v10 }
 0x247   :  { %2054 = vmatprep.subr.bf16.mxu0 %v3039_v44  ;;  %2097 = vmatprep.subr.bf16.mxu1 %v3042_v45  ;;  %v1221_v44 = vrot.slane %v1208_v38, %v214_v11  ;;  %v3138_v38 = vld [vmem:[#allocation13 + $0xc4] ss:$8 sps:$4 sm:$0xff]  }
 0x24a   :  { %2055 = vmatpush1.bf16.msra.mxu0 %v3037_v46  ;;  %2098 = vmatpush1.bf16.msra.mxu1 %v3040_v47 }
 0x24b   :  { %2056 = vmatprep.subr.bf16.mxu0 %v3045_v48  ;;  %2099 = vmatprep.subr.bf16.mxu1 %v3048_v49 }
 0x24e   :  { %2057 = vmatpush1.bf16.msra.mxu0 %v3043_v50  ;;  %2100 = vmatpush1.bf16.msra.mxu1 %v3046_v51 }
 0x24f   :  { %2058 = vmatprep.subr.bf16.mxu0 %v3051_v52  ;;  %2101 = vmatprep.subr.bf16.mxu1 %v3054_v53 }
 0x252   :  { %2059 = vmatpush1.bf16.msra.mxu0 %v3049_v54  ;;  %2102 = vmatpush1.bf16.msra.mxu1 %v3052_v55 }
 0x253   :  { %2060 = vmatprep.subr.bf16.mxu0 %v3057_v56  ;;  %2103 = vmatprep.subr.bf16.mxu1 %v3060_v57 }
 0x256   :  { %2061 = vmatpush2.bf16.msra.mxu0 %v3055_v58  ;;  %2104 = vmatpush2.bf16.msra.mxu1 %v3058_v59 }
 0x257   :  { %2062 = vmatprep.subr.bf16.mxu0 %v3063_v60  ;;  %2105 = vmatprep.subr.bf16.mxu1 %v3066_v61 }
 0x25a   :  { %2063 = vmatpush2.bf16.msra.mxu0 %v3061_v62  ;;  %2106 = vmatpush2.bf16.msra.mxu1 %v3064_v63 }
 0x25b   :  { %2064 = vmatprep.subr.bf16.mxu0 %v3069_v0  ;;  %2107 = vmatprep.subr.bf16.mxu1 %v3072_v1 }
 0x25e   :  { %2065 = vmatpush2.bf16.msra.mxu0 %v3067_v2  ;;  %2108 = vmatpush2.bf16.msra.mxu1 %v3070_v3  ;;  %v3103_v2 = vld [vmem:[#allocation13 + $0x70] ss:$8 sps:$4 sm:$0xff]  }
 0x25f   :  { %2066 = vmatprep.subr.bf16.mxu0 %v3075_v4  ;;  %2109 = vmatprep.subr.bf16.mxu1 %v3078_v5  ;;  %v3108_v5 = vld [vmem:[#allocation13 + $0x64] ss:$8 sps:$4 sm:$0xff]  }
 0x262   :  { %2067 = vmatpush2.bf16.msra.mxu0 %v3073_v6  ;;  %2110 = vmatpush2.bf16.msra.mxu1 %v3076_v12  ;;  %v3106_v6 = vld [vmem:[#allocation13 + $0x60] ss:$8 sps:$4 sm:$0xff]   ;;  %v3111_v12 = vld [vmem:[#allocation13 + $0x54] ss:$8 sps:$4 sm:$0xff]  }
 0x263   :  { %2068 = vmatprep.subr.bf16.mxu0 %v3081_v13  ;;  %2111 = vmatprep.subr.bf16.mxu1 %v3084_v14  ;;  %v3109_v13 = vld [vmem:[#allocation13 + $0x50] ss:$8 sps:$4 sm:$0xff]   ;;  %v3114_v14 = vld [vmem:[#allocation13 + $0x44] ss:$8 sps:$4 sm:$0xff]  }
 0x266   :  { %2069 = vmatpush2.bf16.msra.mxu0 %v3079_v17  ;;  %2112 = vmatpush2.bf16.msra.mxu1 %v3082_v24  ;;  %v3112_v17 = vld [vmem:[#allocation13 + $0x40] ss:$8 sps:$4 sm:$0xff]   ;;  %v3117_v24 = vld [vmem:[#allocation13 + $0x34] ss:$8 sps:$4 sm:$0xff]  }
 0x267   :  { %2070 = vmatprep.subr.bf16.mxu0 %v3087_v25  ;;  %2113 = vmatprep.subr.bf16.mxu1 %v3090_v26  ;;  %v3115_v25 = vld [vmem:[#allocation13 + $0x30] ss:$8 sps:$4 sm:$0xff]   ;;  %v3120_v26 = vld [vmem:[#allocation13 + $0x24] ss:$8 sps:$4 sm:$0xff]  }
 0x26a   :  { %2071 = vmatpush2.bf16.msra.mxu0 %v3085_v27  ;;  %2114 = vmatpush2.bf16.msra.mxu1 %v3088_v28  ;;  %v3118_v27 = vld [vmem:[#allocation13 + $0x20] ss:$8 sps:$4 sm:$0xff]   ;;  %v3123_v28 = vld [vmem:[#allocation13 + $0x14] ss:$8 sps:$4 sm:$0xff]  }
 0x26b   :  { %2072 = vmatprep.subr.bf16.mxu0 %v3093_v29  ;;  %2115 = vmatprep.subr.bf16.mxu1 %v3096_v30  ;;  %v3121_v29 = vld [vmem:[#allocation13 + $0x10] ss:$8 sps:$4 sm:$0xff]   ;;  %v3126_v30 = vld [vmem:[#allocation13 + $0x4] ss:$8 sps:$4 sm:$0xff]  }
 0x26e   :  { %2073 = vmatpush2.bf16.msra.mxu0 %v3091_v31  ;;  %2116 = vmatpush2.bf16.msra.mxu1 %v3094_v32  ;;  %v3124_v31 = vld [vmem:[#allocation13] ss:$8 sps:$4 sm:$0xff]   ;;  %v3129_v32 = vld [vmem:[#allocation13 + $0xf4] ss:$8 sps:$4 sm:$0xff]  }
 0x26f   :  { %2074 = vmatprep.subr.bf16.mxu0 %v3099_v33  ;;  %2117 = vmatprep.subr.bf16.mxu1 %v3102_v34  ;;  %v3127_v33 = vld [vmem:[#allocation13 + $0xf0] ss:$8 sps:$4 sm:$0xff]   ;;  %v3132_v34 = vld [vmem:[#allocation13 + $0xe4] ss:$8 sps:$4 sm:$0xff]  }
 0x272   :  { %2075 = vmatpush2.bf16.msra.mxu0 %v3097_v35  ;;  %2118 = vmatpush2.bf16.msra.mxu1 %v3100_v36  ;;  %v3130_v35 = vld [vmem:[#allocation13 + $0xe0] ss:$8 sps:$4 sm:$0xff]   ;;  %v3135_v36 = vld [vmem:[#allocation13 + $0xd4] ss:$8 sps:$4 sm:$0xff]  }
 0x273   :  { %2344 = vmatprep.subr.bf16.mxu0 %v3105_v37  ;;  %v3133_v37 = vld [vmem:[#allocation13 + $0xd0] ss:$8 sps:$4 sm:$0xff]  }
 0x2f5   :  { %v1584_v39 = vpop.f32.mrf.mxu0  ;;  %v1627_v40 = vpop.f32.mrf.mxu1 }
 0x2f6   :  { %v1585_v53 = vadd.f32 %v1584_v39, %v1213_v43  ;;  %v1628_v54 = vadd.f32 %v1627_v40, %v1221_v44  ;;  %v3136_v39 = vld [vmem:[#allocation13 + $0xc0] ss:$8 sps:$4 sm:$0xff]   ;;  %v3141_v40 = vld [vmem:[#allocation13 + $0xb4] ss:$8 sps:$4 sm:$0xff]  }
 0x2f7   :  { %v1586_v45 = vpop.f32.mrf.mxu0  ;;  %v1629_v46 = vpop.f32.mrf.mxu1 }
 0x2f8   :  { %v1587_v49 = vadd.f32 %v1586_v45, %v1217_v41  ;;  %v1630_v50 = vadd.f32 %v1629_v46, %v1225_v42  ;;  %v1636_v62 = vmax.f32 %v1585_v53, 0.0  ;;  %v1638_v63 = vmax.f32 %v1628_v54, 0.0  ;;  %v3145_v45 = vld [vmem:[#allocation13 + $0x90] ss:$8 sps:$4 sm:$0xff]   ;;  %v3150_v46 = vld [vmem:[#allocation13 + $0x84] ss:$8 sps:$4 sm:$0xff]  }
 0x2f9   :  { %v1588_v47 = vpop.f32.mrf.mxu0  ;;  %v1631_v48 = vpop.f32.mrf.mxu1 }
 0x2fa   :  { %v1589_v51 = vadd.f32 %v1588_v47, %v1213_v43  ;;  %v1632_v52 = vadd.f32 %v1631_v48, %v1221_v44  ;;  %v1637_v60 = vmax.f32 %v1587_v49, 0.0  ;;  %v1639_v61 = vmax.f32 %v1630_v50, 0.0  ;;  %v3142_v43 = vld [vmem:[#allocation13 + $0xa0] ss:$8 sps:$4 sm:$0xff]   ;;  %v3147_v44 = vld [vmem:[#allocation13 + $0x94] ss:$8 sps:$4 sm:$0xff]  }
 0x2fb   :  { %v1590_v55 = vpop.f32.mrf.mxu0  ;;  %v1633_v56 = vpop.f32.mrf.mxu1  ;;  %v3148_v47 = vld [vmem:[#allocation13 + $0x80] ss:$8 sps:$4 sm:$0xff]   ;;  %v1712_v48 = vld [vmem:[%s3516_s8] sm:$0x3] }
 0x2fc   :  { %v1591_v57 = vadd.f32 %v1590_v55, %v1217_v41  ;;  %v1634_v58 = vadd.f32 %v1633_v56, %v1225_v42  ;;  %v1640_v9 = vmax.f32 %v1589_v51, 0.0  ;;  %v1642_v59 = vmax.f32 %v1632_v52, 0.0  ;;  %v3139_v41 = vld [vmem:[#allocation13 + $0xb0] ss:$8 sps:$4 sm:$0xff]   ;;  %v3144_v42 = vld [vmem:[#allocation13 + $0xa4] ss:$8 sps:$4 sm:$0xff]  }
 0x2fd   :  { %v1717_v49 = vrot.slane %v1712_v48, %v3441_v10  ;;  %v1721_v50 = vrot.slane %v1712_v48, %v3437_v8 }
 0x2fe   :  { %v1641_v7 = vmax.f32 %v1591_v57, 0.0  ;;  %v1643_v11 = vmax.f32 %v1634_v58, 0.0  ;;  %v1644_v3 = vpack.c.bf16 %v1640_v9, %v1636_v62  ;;  %v1646_v4 = vpack.c.bf16 %v1642_v59, %v1638_v63 }
 0x300   :  { %v1645_v0 = vpack.c.bf16 %v1641_v7, %v1637_v60  ;;  %v1647_v1 = vpack.c.bf16 %v1643_v11, %v1639_v61 }
 0x302   :  { %2076 = vmatprep.mubr.bf16.mxu0 %v1645_v0  ;;  %2119 = vmatprep.mubr.bf16.mxu1 %v1647_v1 }
 0x303   :  { %2077 = vmatmul.mubr.bf16.vlgmr.msra.gmra.mxu0 %v1644_v3  ;;  %2120 = vmatmul.mubr.bf16.vlgmr.msra.gmra.mxu1 %v1646_v4 }
 0x304   :  { %2345 = vmatpush1.bf16.msra.mxu0 %v3103_v2 }
 0x305   :  { %2346 = vmatprep.subr.bf16.mxu0 %v3108_v5 }
 0x308   :  { %2347 = vmatpush1.bf16.msra.mxu0 %v3106_v6 }
 0x309   :  { %2348 = vmatprep.subr.bf16.mxu0 %v3111_v12 }
 0x30c   :  { %2349 = vmatpush1.bf16.msra.mxu0 %v3109_v13 }
 0x30d   :  { %2350 = vmatprep.subr.bf16.mxu0 %v3114_v14 }
 0x310   :  { %2351 = vmatpush1.bf16.msra.mxu0 %v3112_v17 }
 0x311   :  { %2352 = vmatprep.subr.bf16.mxu0 %v3117_v24 }
 0x314   :  { %2353 = vmatpush1.bf16.msra.mxu0 %v3115_v25 }
 0x315   :  { %2354 = vmatprep.subr.bf16.mxu0 %v3120_v26 }
 0x318   :  { %2355 = vmatpush1.bf16.msra.mxu0 %v3118_v27 }
 0x319   :  { %2356 = vmatprep.subr.bf16.mxu0 %v3123_v28 }
 0x31c   :  { %2357 = vmatpush1.bf16.msra.mxu0 %v3121_v29 }
 0x31d   :  { %2358 = vmatprep.subr.bf16.mxu0 %v3126_v30 }
 0x320   :  { %2359 = vmatpush1.bf16.msra.mxu0 %v3124_v31 }
 0x321   :  { %2360 = vmatprep.subr.bf16.mxu0 %v3129_v32 }
 0x324   :  { %2361 = vmatpush2.bf16.msra.mxu0 %v3127_v33 }
 0x325   :  { %2362 = vmatprep.subr.bf16.mxu0 %v3132_v34 }
 0x328   :  { %2363 = vmatpush2.bf16.msra.mxu0 %v3130_v35 }
 0x329   :  { %2364 = vmatprep.subr.bf16.mxu0 %v3135_v36 }
 0x32c   :  { %2365 = vmatpush2.bf16.msra.mxu0 %v3133_v37 }
 0x32d   :  { %2366 = vmatprep.subr.bf16.mxu0 %v3138_v38 }
 0x330   :  { %2367 = vmatpush2.bf16.msra.mxu0 %v3136_v39 }
 0x331   :  { %2368 = vmatprep.subr.bf16.mxu0 %v3141_v40 }
 0x334   :  { %2369 = vmatpush2.bf16.msra.mxu0 %v3139_v41 }
 0x335   :  { %2370 = vmatprep.subr.bf16.mxu0 %v3144_v42 }
 0x338   :  { %2371 = vmatpush2.bf16.msra.mxu0 %v3142_v43 }
 0x339   :  { %2372 = vmatprep.subr.bf16.mxu0 %v3147_v44 }
 0x33c   :  { %2373 = vmatpush2.bf16.msra.mxu0 %v3145_v45 }
 0x33d   :  { %2374 = vmatprep.subr.bf16.mxu0 %v3150_v46 }
 0x340   :  { %2375 = vmatpush2.bf16.msra.mxu0 %v3148_v47 }
 0x3c3   :  { %v2078_v51 = vpop.f32.mrf.mxu0  ;;  %v2121_v52 = vpop.f32.mrf.mxu1 }
 0x3c4   :  { %v2079_v53 = vadd.f32 %v2078_v51, %v1717_v49 }
 0x3c5   :  { %v2080_v54 = vpop.f32.mrf.mxu0  ;;  %v2123_v55 = vpop.f32.mrf.mxu1 }
 0x3c6   :  { %v2081_v56 = vadd.f32 %v2080_v54, %v1721_v50  ;;  %v2122_v60 = vadd.f32 %v2121_v52, %v2079_v53 }
 0x3c7   :  { %v2082_v57 = vpop.f32.mrf.mxu0  ;;  %v2125_v58 = vpop.f32.mrf.mxu1 }
 0x3c8   :  { %v2124_v9 = vadd.f32 %v2123_v55, %v2081_v56  ;;  %v2083_v59 = vadd.f32 %v2082_v57, %v1717_v49  ;;  %v2130_v2 = vadd.f32 %v2122_v60, %v1138_v23 }
 0x3c9   :  { %v2084_v61 = vpop.f32.mrf.mxu0  ;;  %v2127_v62 = vpop.f32.mrf.mxu1 }
 0x3ca   :  { %v2126_v7 = vadd.f32 %v2125_v58, %v2083_v59  ;;  %v2085_v11 = vadd.f32 %v2084_v61, %v1721_v50  ;;  %v2131_v63 = vadd.f32 %v2124_v9, %v1139_v21  ;;  %v2134_v12 = vmax.f32 %v2130_v2, 0.0 }
 0x3cc   :  { %v2132_v0 = vadd.f32 %v2126_v7, %v1140_v20  ;;  %v2128_v1 = vadd.f32 %v2127_v62, %v2085_v11  ;;  %v2135_v5 = vmax.f32 %v2131_v63, 0.0 }
 0x3ce   :  { %v2133_v3 = vadd.f32 %v2128_v1, %v1141_v22  ;;  %v2136_v4 = vmax.f32 %v2132_v0, 0.0 }
 0x3d0   :  { %v2137_v6 = vmax.f32 %v2133_v3, 0.0  ;;  %v2138_v14 = vpack.c.bf16 %v2136_v4, %v2134_v12 }
 0x3d2   :  { %v2139_v13 = vpack.c.bf16 %v2137_v6, %v2135_v5 }
 0x3d4   :  { %2376 = vmatprep.mubr.bf16.mxu0 %v2139_v13 }
 0x3d5   :  { %2377 = vmatmul.mubr.bf16.vlgmr.msra.gmra.mxu0 %v2138_v14 }
 0x495   :  { %v2378_v20 = vpop.f32.mrf.mxu0 }
 0x496   :  { %v2379_v21 = vadd.f32 %v2378_v20, %v2177_v16 }
 0x497   :  { %v2380_v19 = vpop.f32.mrf.mxu0 }
 0x498   :  { %v2387_v22 = vmax.f32 %v2379_v21, 0.0  ;;  %v2381_v23 = vadd.f32 %v2380_v19, %v2181_v18 }
 0x499   :  { %v2382_v17 = vpop.f32.mrf.mxu0 }
 0x49a   :  { %2391 = vst [vmem:[#allocation14] sm:$0xff] %v2387_v22  ;;  %v2388_v24 = vmax.f32 %v2381_v23, 0.0  ;;  %v2383_v25 = vadd.f32 %v2382_v17, %v2177_v16 }
 0x49b   :  { %v2384_v26 = vpop.f32.mrf.mxu0 }
 0x49c   :  { %2392 = vst [vmem:[#allocation14 + $0x8] sm:$0xff] %v2388_v24  ;;  %v2389_v27 = vmax.f32 %v2383_v25, 0.0  ;;  %v2385_v28 = vadd.f32 %v2384_v26, %v2181_v18 }
 0x49e   :  { %2393 = vst [vmem:[#allocation14 + $0x10] sm:$0xff] %v2389_v27  ;;  %v2390_v29 = vmax.f32 %v2385_v28, 0.0 }
 0x4a0   :  { %2394 = vst [vmem:[#allocation14 + $0x18] sm:$0xff] %v2390_v29 }
 0x4a1   :  { %3304 = shalt.err (!%p3301_p11)
}
 0x4a2   :  { %2406 = dma.vmem_to_hbm [thread:$0]  %s2401_s18, 512, %s3519_s11, [#allocation4], %s3324_s20, %s3324_s20, %s3325_s21  }
 0x4a3   :  { %3321 = dma.done.wait [#allocation4], 512  }
 0x4a4   :  { %3322 = vsyncadd [#allocation4], 4294966784 }
 0x4a5   :  { %2410 = vsyncpa [#allocation3], 1 }
 0x4a6   :  { %2411 = vsyncpa [#allocation6], 1 }
 0x4a7   :  { %2412 = vsyncpa [#allocation9], 1 }
 0x4a8   :  { %2413 = vsyncpa [#allocation12], 1 }
 0x4a9   :  { %2414 = vsyncpa [#allocation4], 1 }

</bundles_post_ra>
